<compile_context>
chip_gen: v7x
topology: tpu7x:2x2x1
jax: 0.10.0
libtpu: 0.0.40
codegen_flags: <defaults>
</compile_context>

<pallas_src>
import functools

import jax
import jax.numpy as jnp
from jax import lax
from jax.experimental import pallas as pl
from jax.experimental.pallas import tpu as pltpu

HIDDENS = (256, 256, 128, 64, 32, 1)   # layer output widths of the reference module
LANE = 128                             # TPU lane width

# Contract the last dim of both operands (A @ B^T) -- same pattern as q @ k^T in the
# official Pallas flash-attention kernel.
_TRANS_B_DIMS = (((1,), (1,)), ((), ()))


def _round_up(n, m):
    return ((n + m - 1) // m) * m


@functools.lru_cache(maxsize=None)
def _tensorcores_per_chip():
    """v7x has 2 TensorCores/chip; v5e/v6e have 1 (best-effort detection, safe default 1)."""
    try:
        kind = jax.devices()[0].device_kind.lower()
        if "v7" in kind:
            return 2
    except Exception:
        pass
    return 1


def _choose_tile_m(batch, requested, n_cores):
    """One big tile on 1-TC chips; >= n_cores parallel tiles on multi-TC chips."""
    requested = max(8, _round_up(requested, 8))
    if n_cores > 1:
        per_core = _round_up((batch + n_cores - 1) // n_cores, 8)
        return max(8, min(requested, per_core))
    return max(8, min(requested, _round_up(batch, 8)))


# ----------------------------------------------------------------------------------
# Kernel
# ----------------------------------------------------------------------------------
def _mlp_kernel(x_ref,
                w1, b1, w2, b2, w3, b3, w4, b4, w5, b5, w6t, b6,
                o_ref):
    """Whole forward pass for one batch tile; all padded bf16 weights resident in VMEM."""

    def layer(h, w_ref, b_ref):
        # bf16 x bf16 on the MXU, f32 accumulation; bias add + ReLU on the f32 accumulator.
        acc = jnp.dot(h, w_ref[...], preferred_element_type=jnp.float32)
        acc = jnp.maximum(acc + b_ref[...], 0.0)
        return acc.astype(jnp.bfloat16)

    h = x_ref[...]          # (tile_m, D_pad) bf16 -- cast + pad already done in the wrapper
    h = layer(h, w1, b1)    # Linear(D, 256)   + ReLU   (Dropout(0.6) = identity)
    h = layer(h, w2, b2)    # Linear(256, 256) + ReLU   (Dropout(0.6) = identity)
    h = layer(h, w3, b3)    # Linear(256, 128) + ReLU   (Dropout(0.6) = identity)
    h = layer(h, w4, b4)    # Linear(128, 64)  + ReLU   (Dropout(0.4) = identity, lane-padded)
    h = layer(h, w5, b5)    # Linear(64, 32)   + ReLU   (Dropout(0.4) = identity, lane-padded)

    # Linear(32, 1) computed transposed: y[0, :] = w6^T @ h^T + b6 (rows 1..7 are zero
    # padding).  The tile_m scalars land in lanes -> lane-dense (8, tile_m) f32 store,
    # ~16x less output HBM than a (tile_m, 128) f32 slab.
    y = lax.dot_general(w6t[...], h, _TRANS_B_DIMS,
                        preferred_element_type=jnp.float32)      # (8, tile_m) f32
    o_ref[...] = y + b6[...]


# ----------------------------------------------------------------------------------
# Parameter preparation (one-time; hoisted out of the per-call forward)
# ----------------------------------------------------------------------------------
def init_params(key, input_dim):
    """Deterministic parameter init (Kaiming-uniform-ish scaling, like nn.Linear)."""
    dims = (input_dim,) + HIDDENS
    params = []
    for i in range(len(HIDDENS)):
        key, kw, kb = jax.random.split(key, 3)
        bound = 1.0 / (dims[i] ** 0.5)
        w = jax.random.uniform(kw, (dims[i], dims[i + 1]),
                               minval=-bound, maxval=bound, dtype=jnp.float32)
        b = jax.random.uniform(kb, (1, dims[i + 1]),
                               minval=-bound, maxval=bound, dtype=jnp.float32)
        params.append((w, b))
    return params


def prepare_params(params, input_dim):
    """Pad every layer width to 128 lanes, cast weights to bf16 (biases stay f32),
    and pre-transpose the final Linear(32,1) into an (8, 128) row block.
    Call ONCE; feed the result to hw2_model_forward on every call."""
    dims = (input_dim,) + HIDDENS
    pdims = tuple(_round_up(d, LANE) for d in dims)

    prepared = []
    for i, (w, b) in enumerate(params[:-1]):
        w_p = jnp.zeros((pdims[i], pdims[i + 1]), jnp.bfloat16)
        w_p = w_p.at[:dims[i], :dims[i + 1]].set(w.astype(jnp.bfloat16))
        b_p = jnp.zeros((1, pdims[i + 1]), jnp.float32)
        b_p = b_p.at[:, :dims[i + 1]].set(b)
        prepared.extend([w_p, b_p])

    # Final Linear(32, 1): store w6 as a transposed (8, 128) bf16 row block (row 0 real)
    # and b6 as an (8, 1) f32 column, so the kernel can emit a lane-packed output.
    w6, b6 = params[-1]
    w6t = jnp.zeros((8, pdims[-2]), jnp.bfloat16)
    w6t = w6t.at[0, :dims[-2]].set(w6[:, 0].astype(jnp.bfloat16))
    b6p = jnp.zeros((8, 1), jnp.float32).at[0, 0].set(b6[0, 0])
    prepared.extend([w6t, b6p])
    return tuple(prepared)


# ----------------------------------------------------------------------------------
# Forward wrapper
# ----------------------------------------------------------------------------------
@functools.partial(jax.jit, static_argnames=("tile_m",))
def hw2_model_forward(x, prepared_params, *, tile_m=512):
    """x: [B, input_dim] float32.  prepared_params: output of prepare_params().
    Returns [B, 1] float32."""
    B, D = x.shape
    D_pad = _round_up(D, LANE)
    assert prepared_params[0].shape[0] == D_pad, "prepared_params do not match input_dim"

    tm = _choose_tile_m(B, tile_m, _tensorcores_per_chip())
    B_pad = _round_up(B, tm)
    G = B_pad // tm

    # Single wrapper op: cast to bf16 + pad batch rows / feature lanes with zeros.
    x_p = x.astype(jnp.bfloat16)
    if (B_pad != B) or (D_pad != D):
        x_p = jnp.pad(x_p, ((0, B_pad - B), (0, D_pad - D)))

    # Weights/biases: one full block each, grid-invariant (resident across steps).
    param_specs = [pl.BlockSpec(p.shape, lambda g: (0, 0)) for p in prepared_params]

    out = pl.pallas_call(
        _mlp_kernel,
        out_shape=jax.ShapeDtypeStruct((G * 8, tm), jnp.float32),
        grid_spec=pltpu.PrefetchScalarGridSpec(
            num_scalar_prefetch=0,
            grid=(G,),
            in_specs=[pl.BlockSpec((tm, D_pad), lambda g: (g, 0))] + param_specs,
            out_specs=pl.BlockSpec((8, tm), lambda g: (g, 0)),
        ),
        compiler_params=pltpu.CompilerParams(
            dimension_semantics=("parallel",)),
    )(x_p, *prepared_params)

    # Row 0 of each 8-row group holds the tm real scalars of that batch tile;
    # padded batch rows are dropped by the [:B] slice.
    y = out.reshape(G, 8, tm)[:, 0, :].reshape(B_pad)
    return y[:B, None]


# ----------------------------------------------------------------------------------
# References (for correctness checks)
# ----------------------------------------------------------------------------------
def _reference_forward_f32(x, params):
    h = x
    for i, (w, b) in enumerate(params):
        h = h @ w + b
        if i < len(params) - 1:
            h = jnp.maximum(h, 0.0)
    return h


def _reference_forward_mixed(x, params):
    """Mimics the kernel's mixed precision exactly (bf16 dot inputs, f32 accumulate)."""
    h = x.astype(jnp.bfloat16)
    for i, (w, b) in enumerate(params):
        h = jnp.dot(h, w.astype(jnp.bfloat16),
                    preferred_element_type=jnp.float32) + b
        if i < len(params) - 1:
            h = jnp.maximum(h, 0.0).astype(jnp.bfloat16)
    return h


if __name__ == "__main__":
    key = jax.random.PRNGKey(0)
    k_in, k_par = jax.random.split(key)

    batch, input_dim = 256, 64           # small shapes consistent with the MLP
    x = jax.random.normal(k_in, (batch, input_dim), dtype=jnp.float32)
    params = init_params(k_par, input_dim)

    # One-time parameter padding / bf16 cast, hoisted out of the forward.
    prepared = prepare_params(params, input_dim)

    out = hw2_model_forward(x, prepared)     # 1 big tile on v5e/v6e, 2 parallel on v7x
    out = jax.block_until_ready(out)
    assert out.shape == (batch, 1)

    # Strict check against a reference using identical mixed precision.
    ref_mixed = _reference_forward_mixed(x, params)
    assert jnp.allclose(out, ref_mixed, atol=2e-3, rtol=2e-3), \
        "mismatch vs mixed-precision reference"

    # Loose check against the pure-f32 reference (bf16 rounding through 6 layers).
    ref_f32 = _reference_forward_f32(x, params)
    assert jnp.allclose(out, ref_f32, atol=1e-1, rtol=1e-1), \
        "mismatch vs f32 reference"

    print("KERNEL_OK")
</pallas_src>

<mosaic_0001>
module attributes {stable_mosaic.version = 11 : i64} {
  func.func @_mlp_kernel(%arg0: i32, %arg1: memref<256x128xbf16, #tpu.memory_space<vmem>>, %arg2: memref<128x256xbf16, #tpu.memory_space<vmem>>, %arg3: memref<1x256xf32, #tpu.memory_space<vmem>>, %arg4: memref<256x256xbf16, #tpu.memory_space<vmem>>, %arg5: memref<1x256xf32, #tpu.memory_space<vmem>>, %arg6: memref<256x128xbf16, #tpu.memory_space<vmem>>, %arg7: memref<1x128xf32, #tpu.memory_space<vmem>>, %arg8: memref<128x128xbf16, #tpu.memory_space<vmem>>, %arg9: memref<1x128xf32, #tpu.memory_space<vmem>>, %arg10: memref<128x128xbf16, #tpu.memory_space<vmem>>, %arg11: memref<1x128xf32, #tpu.memory_space<vmem>>, %arg12: memref<8x128xbf16, #tpu.memory_space<vmem>>, %arg13: memref<8x1xf32, #tpu.memory_space<vmem>>, %arg14: memref<8x256xf32, #tpu.memory_space<vmem>>) attributes {dimension_semantics = [#tpu.dimension_semantics<parallel>], iteration_bounds = array<i64: 1>, scalar_prefetch = 0 : i64, scratch_operands = 0 : i64, tpu.core_type = #tpu.core_type<tc>, window_params = [{transform_indices = @transform_0, window_bounds = array<i64: 256, 128>}, {pipeline_mode = #tpu.pipeline_mode<synchronous>, transform_indices = @transform_1, window_bounds = array<i64: 128, 256>}, {pipeline_mode = #tpu.pipeline_mode<synchronous>, transform_indices = @transform_2, window_bounds = array<i64: 1, 256>}, {pipeline_mode = #tpu.pipeline_mode<synchronous>, transform_indices = @transform_3, window_bounds = array<i64: 256, 256>}, {pipeline_mode = #tpu.pipeline_mode<synchronous>, transform_indices = @transform_4, window_bounds = array<i64: 1, 256>}, {pipeline_mode = #tpu.pipeline_mode<synchronous>, transform_indices = @transform_5, window_bounds = array<i64: 256, 128>}, {pipeline_mode = #tpu.pipeline_mode<synchronous>, transform_indices = @transform_6, window_bounds = array<i64: 1, 128>}, {pipeline_mode = #tpu.pipeline_mode<synchronous>, transform_indices = @transform_7, window_bounds = array<i64: 128, 128>}, {pipeline_mode = #tpu.pipeline_mode<synchronous>, transform_indices = @transform_8, window_bounds = array<i64: 1, 128>}, {pipeline_mode = #tpu.pipeline_mode<synchronous>, transform_indices = @transform_9, window_bounds = array<i64: 128, 128>}, {pipeline_mode = #tpu.pipeline_mode<synchronous>, transform_indices = @transform_10, window_bounds = array<i64: 1, 128>}, {pipeline_mode = #tpu.pipeline_mode<synchronous>, transform_indices = @transform_11, window_bounds = array<i64: 8, 128>}, {pipeline_mode = #tpu.pipeline_mode<synchronous>, transform_indices = @transform_12, window_bounds = array<i64: 8, 1>}, {transform_indices = @transform_13, window_bounds = array<i64: 8, 256>}]} {
    %c0 = arith.constant 0 : index
    %c0_0 = arith.constant 0 : index
    %0 = vector.load %arg1[%c0, %c0_0] : memref<256x128xbf16, #tpu.memory_space<vmem>>, vector<256x128xbf16>
    %c0_1 = arith.constant 0 : index
    %c0_2 = arith.constant 0 : index
    %1 = vector.load %arg2[%c0_1, %c0_2] : memref<128x256xbf16, #tpu.memory_space<vmem>>, vector<128x256xbf16>
    %cst = arith.constant dense<0.000000e+00> : vector<256x256xf32>
    %2 = tpu.matmul %0, %1, %cst {dimension_numbers = #tpu.dot_dimension_numbers<[1], [0], [0], [1], [0, 0, 1, 1], [], []>} : vector<256x128xbf16>, vector<128x256xbf16>, vector<256x256xf32> -> vector<256x256xf32>
    %c0_3 = arith.constant 0 : index
    %c0_4 = arith.constant 0 : index
    %3 = vector.load %arg3[%c0_3, %c0_4] : memref<1x256xf32, #tpu.memory_space<vmem>>, vector<1x256xf32>
    %4 = vector.broadcast %3 : vector<1x256xf32> to vector<256x256xf32>
    %5 = arith.addf %2, %4 : vector<256x256xf32>
    %cst_5 = arith.constant 0.000000e+00 : f32
    %6 = vector.broadcast %cst_5 : f32 to vector<256x256xf32>
    %7 = arith.maximumf %5, %6 : vector<256x256xf32>
    %8 = arith.truncf %7 : vector<256x256xf32> to vector<256x256xbf16>
    %c0_6 = arith.constant 0 : index
    %c0_7 = arith.constant 0 : index
    %9 = vector.load %arg4[%c0_6, %c0_7] : memref<256x256xbf16, #tpu.memory_space<vmem>>, vector<256x256xbf16>
    %cst_8 = arith.constant dense<0.000000e+00> : vector<256x256xf32>
    %10 = tpu.matmul %8, %9, %cst_8 {dimension_numbers = #tpu.dot_dimension_numbers<[1], [0], [0], [1], [0, 0, 1, 1], [], []>} : vector<256x256xbf16>, vector<256x256xbf16>, vector<256x256xf32> -> vector<256x256xf32>
    %c0_9 = arith.constant 0 : index
    %c0_10 = arith.constant 0 : index
    %11 = vector.load %arg5[%c0_9, %c0_10] : memref<1x256xf32, #tpu.memory_space<vmem>>, vector<1x256xf32>
    %12 = vector.broadcast %11 : vector<1x256xf32> to vector<256x256xf32>
    %13 = arith.addf %10, %12 : vector<256x256xf32>
    %cst_11 = arith.constant 0.000000e+00 : f32
    %14 = vector.broadcast %cst_11 : f32 to vector<256x256xf32>
    %15 = arith.maximumf %13, %14 : vector<256x256xf32>
    %16 = arith.truncf %15 : vector<256x256xf32> to vector<256x256xbf16>
    %c0_12 = arith.constant 0 : index
    %c0_13 = arith.constant 0 : index
    %17 = vector.load %arg6[%c0_12, %c0_13] : memref<256x128xbf16, #tpu.memory_space<vmem>>, vector<256x128xbf16>
    %cst_14 = arith.constant dense<0.000000e+00> : vector<256x128xf32>
    %18 = tpu.matmul %16, %17, %cst_14 {dimension_numbers = #tpu.dot_dimension_numbers<[1], [0], [0], [1], [0, 0, 1, 1], [], []>} : vector<256x256xbf16>, vector<256x128xbf16>, vector<256x128xf32> -> vector<256x128xf32>
    %c0_15 = arith.constant 0 : index
    %c0_16 = arith.constant 0 : index
    %19 = vector.load %arg7[%c0_15, %c0_16] : memref<1x128xf32, #tpu.memory_space<vmem>>, vector<1x128xf32>
    %20 = vector.broadcast %19 : vector<1x128xf32> to vector<256x128xf32>
    %21 = arith.addf %18, %20 : vector<256x128xf32>
    %cst_17 = arith.constant 0.000000e+00 : f32
    %22 = vector.broadcast %cst_17 : f32 to vector<256x128xf32>
    %23 = arith.maximumf %21, %22 : vector<256x128xf32>
    %24 = arith.truncf %23 : vector<256x128xf32> to vector<256x128xbf16>
    %c0_18 = arith.constant 0 : index
    %c0_19 = arith.constant 0 : index
    %25 = vector.load %arg8[%c0_18, %c0_19] : memref<128x128xbf16, #tpu.memory_space<vmem>>, vector<128x128xbf16>
    %cst_20 = arith.constant dense<0.000000e+00> : vector<256x128xf32>
    %26 = tpu.matmul %24, %25, %cst_20 {dimension_numbers = #tpu.dot_dimension_numbers<[1], [0], [0], [1], [0, 0, 1, 1], [], []>} : vector<256x128xbf16>, vector<128x128xbf16>, vector<256x128xf32> -> vector<256x128xf32>
    %c0_21 = arith.constant 0 : index
    %c0_22 = arith.constant 0 : index
    %27 = vector.load %arg9[%c0_21, %c0_22] : memref<1x128xf32, #tpu.memory_space<vmem>>, vector<1x128xf32>
    %28 = vector.broadcast %27 : vector<1x128xf32> to vector<256x128xf32>
    %29 = arith.addf %26, %28 : vector<256x128xf32>
    %cst_23 = arith.constant 0.000000e+00 : f32
    %30 = vector.broadcast %cst_23 : f32 to vector<256x128xf32>
    %31 = arith.maximumf %29, %30 : vector<256x128xf32>
    %32 = arith.truncf %31 : vector<256x128xf32> to vector<256x128xbf16>
    %c0_24 = arith.constant 0 : index
    %c0_25 = arith.constant 0 : index
    %33 = vector.load %arg10[%c0_24, %c0_25] : memref<128x128xbf16, #tpu.memory_space<vmem>>, vector<128x128xbf16>
    %cst_26 = arith.constant dense<0.000000e+00> : vector<256x128xf32>
    %34 = tpu.matmul %32, %33, %cst_26 {dimension_numbers = #tpu.dot_dimension_numbers<[1], [0], [0], [1], [0, 0, 1, 1], [], []>} : vector<256x128xbf16>, vector<128x128xbf16>, vector<256x128xf32> -> vector<256x128xf32>
    %c0_27 = arith.constant 0 : index
    %c0_28 = arith.constant 0 : index
    %35 = vector.load %arg11[%c0_27, %c0_28] : memref<1x128xf32, #tpu.memory_space<vmem>>, vector<1x128xf32>
    %36 = vector.broadcast %35 : vector<1x128xf32> to vector<256x128xf32>
    %37 = arith.addf %34, %36 : vector<256x128xf32>
    %cst_29 = arith.constant 0.000000e+00 : f32
    %38 = vector.broadcast %cst_29 : f32 to vector<256x128xf32>
    %39 = arith.maximumf %37, %38 : vector<256x128xf32>
    %40 = arith.truncf %39 : vector<256x128xf32> to vector<256x128xbf16>
    %c0_30 = arith.constant 0 : index
    %c0_31 = arith.constant 0 : index
    %41 = vector.load %arg12[%c0_30, %c0_31] : memref<8x128xbf16, #tpu.memory_space<vmem>>, vector<8x128xbf16>
    %cst_32 = arith.constant dense<0.000000e+00> : vector<8x256xf32>
    %42 = tpu.matmul %41, %40, %cst_32 {dimension_numbers = #tpu.dot_dimension_numbers<[1], [1], [0], [0], [0, 0, 1, 0], [], []>} : vector<8x128xbf16>, vector<256x128xbf16>, vector<8x256xf32> -> vector<8x256xf32>
    %c0_33 = arith.constant 0 : index
    %c0_34 = arith.constant 0 : index
    %43 = vector.load %arg13[%c0_33, %c0_34] : memref<8x1xf32, #tpu.memory_space<vmem>>, vector<8x1xf32>
    %44 = vector.broadcast %43 : vector<8x1xf32> to vector<8x256xf32>
    %45 = arith.addf %42, %44 : vector<8x256xf32>
    %c0_35 = arith.constant 0 : index
    %c0_36 = arith.constant 0 : index
    %46 = vector.load %arg14[%c0_35, %c0_36] : memref<8x256xf32, #tpu.memory_space<vmem>>, vector<8x256xf32>
    tpu.vector_store %arg14[%c0_35, %c0_36], %45 {strides = array<i32>} : memref<8x256xf32, #tpu.memory_space<vmem>>, vector<8x256xf32>,
    return
  }
  func.func @transform_0(%arg0: i32) -> (i32, i32) {
    %c0_i32 = arith.constant 0 : i32
    %c0_i32_0 = arith.constant 0 : i32
    return %arg0, %c0_i32 : i32, i32
  }
  func.func @transform_1(%arg0: i32) -> (i32, i32) {
    %c0_i32 = arith.constant 0 : i32
    %c0_i32_0 = arith.constant 0 : i32
    %c0_i32_1 = arith.constant 0 : i32
    return %c0_i32, %c0_i32_0 : i32, i32
  }
  func.func @transform_2(%arg0: i32) -> (i32, i32) {
    %c0_i32 = arith.constant 0 : i32
    %c0_i32_0 = arith.constant 0 : i32
    %c0_i32_1 = arith.constant 0 : i32
    return %c0_i32, %c0_i32_0 : i32, i32
  }
  func.func @transform_3(%arg0: i32) -> (i32, i32) {
    %c0_i32 = arith.constant 0 : i32
    %c0_i32_0 = arith.constant 0 : i32
    %c0_i32_1 = arith.constant 0 : i32
    return %c0_i32, %c0_i32_0 : i32, i32
  }
  func.func @transform_4(%arg0: i32) -> (i32, i32) {
    %c0_i32 = arith.constant 0 : i32
    %c0_i32_0 = arith.constant 0 : i32
    %c0_i32_1 = arith.constant 0 : i32
    return %c0_i32, %c0_i32_0 : i32, i32
  }
  func.func @transform_5(%arg0: i32) -> (i32, i32) {
    %c0_i32 = arith.constant 0 : i32
    %c0_i32_0 = arith.constant 0 : i32
    %c0_i32_1 = arith.constant 0 : i32
    return %c0_i32, %c0_i32_0 : i32, i32
  }
  func.func @transform_6(%arg0: i32) -> (i32, i32) {
    %c0_i32 = arith.constant 0 : i32
    %c0_i32_0 = arith.constant 0 : i32
    %c0_i32_1 = arith.constant 0 : i32
    return %c0_i32, %c0_i32_0 : i32, i32
  }
  func.func @transform_7(%arg0: i32) -> (i32, i32) {
    %c0_i32 = arith.constant 0 : i32
    %c0_i32_0 = arith.constant 0 : i32
    %c0_i32_1 = arith.constant 0 : i32
    return %c0_i32, %c0_i32_0 : i32, i32
  }
  func.func @transform_8(%arg0: i32) -> (i32, i32) {
    %c0_i32 = arith.constant 0 : i32
    %c0_i32_0 = arith.constant 0 : i32
    %c0_i32_1 = arith.constant 0 : i32
    return %c0_i32, %c0_i32_0 : i32, i32
  }
  func.func @transform_9(%arg0: i32) -> (i32, i32) {
    %c0_i32 = arith.constant 0 : i32
    %c0_i32_0 = arith.constant 0 : i32
    %c0_i32_1 = arith.constant 0 : i32
    return %c0_i32, %c0_i32_0 : i32, i32
  }
  func.func @transform_10(%arg0: i32) -> (i32, i32) {
    %c0_i32 = arith.constant 0 : i32
    %c0_i32_0 = arith.constant 0 : i32
    %c0_i32_1 = arith.constant 0 : i32
    return %c0_i32, %c0_i32_0 : i32, i32
  }
  func.func @transform_11(%arg0: i32) -> (i32, i32) {
    %c0_i32 = arith.constant 0 : i32
    %c0_i32_0 = arith.constant 0 : i32
    %c0_i32_1 = arith.constant 0 : i32
    return %c0_i32, %c0_i32_0 : i32, i32
  }
  func.func @transform_12(%arg0: i32) -> (i32, i32) {
    %c0_i32 = arith.constant 0 : i32
    %c0_i32_0 = arith.constant 0 : i32
    %c0_i32_1 = arith.constant 0 : i32
    return %c0_i32, %c0_i32_0 : i32, i32
  }
  func.func @transform_13(%arg0: i32) -> (i32, i32) {
    %c0_i32 = arith.constant 0 : i32
    %c0_i32_0 = arith.constant 0 : i32
    return %arg0, %c0_i32 : i32, i32
  }
}

</mosaic_0001>

<bundles_post_ra>
// kernel: hw2_model_forward.1
= control target key start
LH: loop header
LB: loop body
LE: loop exit
PB: predicated region body
PF: predicated region fallthrough
CT: control target
= control target key end

     0   :  { %18 = vsyncpa [#allocation3], 0  ;;  %s2554_s25 = smov [#allocation2]   ;;  %s3239_s0 = inlined_call_operand.vmem [shape: bf16[256,128], index: 0, kind: input, shape index: {}]   ;;  %s3240_s1 = inlined_call_operand.vmem [shape: bf16[128,256], index: 1, kind: input, shape index: {}]   ;;  %s3241_s2 = inlined_call_operand.vmem [shape: f32[1,256], index: 2, kind: input, shape index: {}]   ;;  %s3242_s3 = inlined_call_operand.vmem [shape: bf16[256,256], index: 3, kind: input, shape index: {}]   ;;  %s3243_s4 = inlined_call_operand.vmem [shape: f32[1,256], index: 4, kind: input, shape index: {}]   ;;  %s3244_s5 = inlined_call_operand.vmem [shape: bf16[256,128], index: 5, kind: input, shape index: {}]   ;;  %s3245_s6 = inlined_call_operand.vmem [shape: f32[1,128], index: 6, kind: input, shape index: {}]   ;;  %s3246_s7 = inlined_call_operand.vmem [shape: bf16[128,128], index: 7, kind: input, shape index: {}]   ;;  %s3247_s8 = inlined_call_operand.vmem [shape: f32[1,128], index: 8, kind: input, shape index: {}]   ;;  %s3248_s9 = inlined_call_operand.vmem [shape: bf16[128,128], index: 9, kind: input, shape index: {}]   ;;  %s3249_s10 = inlined_call_operand.hbm [shape: f32[1,128], index: 10, kind: input, shape index: {}]   ;;  %s3250_s11 = inlined_call_operand.vmem [shape: bf16[8,128], index: 11, kind: input, shape index: {}]   ;;  %s3251_s12 = inlined_call_operand.vmem [shape: f32[8,1], index: 12, kind: input, shape index: {}]   ;;  %s3252_s13 = inlined_call_operand.vmem [shape: f32[8,256], index: 13, kind: output, shape index: {}]  }
   0x1   :  { %s45_s26 = sshll.u32 %s2554_s25, 4  ;;  %s2530_s29 = scalar_lea.hbm %s3249_s10, 16  ;;  %s46_s26 = int_to_ptr.vmem [resolvable:$true] %s45_s26 }
   0x2   :  { %p2531_p0 = scmp.ne.s32.totalorder %s3249_s10, %s2530_s29  ;;  %p2534_p1 = scmp.lt.u32.totalorder %s2530_s29, %s3249_s10 }
   0x4   :  { %p2536_p2 = pnand %p2534_p1, %p2531_p0 }
   0x6   :  { %2539 = shalt.err (!%p2536_p2)
}
   0x7   :  { %s2540_s17 = scalar_lea.vmem %s46_s26, 16  ;;  %s2544_s18 = scalar_lea.vmem %s46_s26, 32 }
   0x8   :  { %p2541_p3 = scmp.ne.s32.totalorder %s46_s26, %s2540_s17  ;;  %p2545_p4 = scmp.lt.s32.totalorder %s46_s26, %s46_s26 }
   0x9   :  { %p2546_p5 = scmp.lt.s32.totalorder %s2544_s18, %s2540_s17 }
   0xb   :  { %p2547_p6 = por %p2546_p5, %p2545_p4 }
   0xd   :  { %p2548_p7 = pnand %p2547_p6, %p2541_p3 }
   0xf   :  { %2551 = shalt.err (!%p2548_p7)
}
  0x10   :  { %48 = dma.hbm_to_vmem [thread:$0]  %s3249_s10, 16, %s46_s26, [#allocation3]  }
  0x11   :  { %2552 = dma.done.wait [#allocation3], 16  }
  0x12   :  { %2553 = vsyncadd [#allocation3], 4294967280  ;;  %v2555_v0 = vmov 0   ;;  %v2410_v1 = vld [vmem:[%s3240_s1 + $0x4] ss:$8 sps:$4 sm:$0xff]   ;;  %v2436_v30 = vld [vmem:[%s3239_s0 + $0x10] sm:$0xff]  }
  0x13   :  { %325 = vmatprep.mubr.bf16.mxu0 %v2555_v0  ;;  %2409 = vset.pattern.permute.xlu0 %v2555_v0  ;;  %v2412_v2 = vld [vmem:[%s3240_s1] ss:$8 sps:$4 sm:$0xff]   ;;  %v2413_v3 = vld [vmem:[%s3240_s1 + $0x14] ss:$8 sps:$4 sm:$0xff]   ;;  %v2415_v4 = vld [vmem:[%s3240_s1 + $0x10] ss:$8 sps:$4 sm:$0xff]  }
  0x14   :  { %293 = vmatprep.subr.bf16.mxu0 %v2410_v1  ;;  %v2416_v5 = vld [vmem:[%s3240_s1 + $0x24] ss:$8 sps:$4 sm:$0xff]   ;;  %v2418_v6 = vld [vmem:[%s3240_s1 + $0x20] ss:$8 sps:$4 sm:$0xff]   ;;  %v2419_v7 = vld [vmem:[%s3240_s1 + $0x34] ss:$8 sps:$4 sm:$0xff]  }
  0x15   :  { %294 = vmatpush1.bf16.msra.mxu0 %v2412_v2  ;;  %v2421_v8 = vld [vmem:[%s3240_s1 + $0x30] ss:$8 sps:$4 sm:$0xff]   ;;  %v2422_v9 = vld [vmem:[%s3240_s1 + $0x44] ss:$8 sps:$4 sm:$0xff]   ;;  %v2424_v10 = vld [vmem:[%s3240_s1 + $0x40] ss:$8 sps:$4 sm:$0xff]   ;;  %v107_v2 = vlaneseq }
  0x16   :  { %295 = vmatprep.subr.bf16.mxu0 %v2413_v3  ;;  %v2425_v11 = vld [vmem:[%s3240_s1 + $0x54] ss:$8 sps:$4 sm:$0xff]   ;;  %v2427_v12 = vld [vmem:[%s3240_s1 + $0x50] ss:$8 sps:$4 sm:$0xff]   ;;  %v2428_v13 = vld [vmem:[%s3240_s1 + $0x64] ss:$8 sps:$4 sm:$0xff]  }
  0x17   :  { %v2430_v14 = vld [vmem:[%s3240_s1 + $0x60] ss:$8 sps:$4 sm:$0xff]   ;;  %v2431_v15 = vld [vmem:[%s3240_s1 + $0x74] ss:$8 sps:$4 sm:$0xff]   ;;  %v2433_v16 = vld [vmem:[%s3240_s1 + $0x70] ss:$8 sps:$4 sm:$0xff]  }
  0x18   :  { %v2450_v17 = vld [vmem:[%s3242_s3 + $0x4] ss:$8 sps:$4 sm:$0xff]   ;;  %v2452_v18 = vld [vmem:[%s3242_s3] ss:$8 sps:$4 sm:$0xff]   ;;  %v2453_v19 = vld [vmem:[%s3242_s3 + $0x14] ss:$8 sps:$4 sm:$0xff]  }
  0x19   :  { %296 = vmatpush1.bf16.msra.mxu0 %v2415_v4  ;;  %786 = vmatprep.subr.bf16.mxu1 %v2450_v17  ;;  %v2434_v20 = vld [vmem:[%s3239_s0] sm:$0xff]   ;;  %v2455_v21 = vld [vmem:[%s3242_s3 + $0x10] ss:$8 sps:$4 sm:$0xff]   ;;  %v2459_v24 = vld [vmem:[%s3242_s3 + $0x34] ss:$8 sps:$4 sm:$0xff]   ;;  %v2847_v3 = vshrl.u32 %v107_v2, 7 }
  0x1a   :  { %297 = vmatprep.subr.bf16.mxu0 %v2416_v5  ;;  %787 = vmatpush1.bf16.msra.mxu1 %v2452_v18  ;;  %v2456_v22 = vld [vmem:[%s3242_s3 + $0x24] ss:$8 sps:$4 sm:$0xff]   ;;  %v2458_v23 = vld [vmem:[%s3242_s3 + $0x20] ss:$8 sps:$4 sm:$0xff]   ;;  %v2461_v26 = vld [vmem:[%s3242_s3 + $0x30] ss:$8 sps:$4 sm:$0xff]  }
  0x1b   :  { %788 = vmatprep.subr.bf16.mxu1 %v2453_v19  ;;  %v2435_v25 = vld [vmem:[%s3239_s0 + $0x8] sm:$0xff]   ;;  %v2465_v29 = vld [vmem:[%s3242_s3 + $0x54] ss:$8 sps:$4 sm:$0xff]   ;;  %v2467_v31 = vld [vmem:[%s3242_s3 + $0x50] ss:$8 sps:$4 sm:$0xff]   ;;  %v109_v4 = vsub.s32 0, %v2847_v3 }
  0x1c   :  { %v2462_v27 = vld [vmem:[%s3242_s3 + $0x44] ss:$8 sps:$4 sm:$0xff]   ;;  %v2464_v28 = vld [vmem:[%s3242_s3 + $0x40] ss:$8 sps:$4 sm:$0xff]   ;;  %v2471_v34 = vld [vmem:[%s3242_s3 + $0x74] ss:$8 sps:$4 sm:$0xff]  }
  0x1d   :  { %298 = vmatpush1.bf16.msra.mxu0 %v2418_v6  ;;  %v2468_v32 = vld [vmem:[%s3242_s3 + $0x64] ss:$8 sps:$4 sm:$0xff]   ;;  %v2470_v33 = vld [vmem:[%s3242_s3 + $0x60] ss:$8 sps:$4 sm:$0xff]   ;;  %v2437_v35 = vld [vmem:[%s3239_s0 + $0x18] sm:$0xff]   ;;  %v113_v6 = vsub.s32 1, %v2847_v3 }
  0x1e   :  { %299 = vmatprep.subr.bf16.mxu0 %v2419_v7  ;;  %789 = vmatpush1.bf16.msra.mxu1 %v2455_v21  ;;  %v2473_v36 = vld [vmem:[%s3242_s3 + $0x70] ss:$8 sps:$4 sm:$0xff]   ;;  %v2474_v37 = vld [vmem:[%s3242_s3 + $0x84] ss:$8 sps:$4 sm:$0xff]   ;;  %v2476_v38 = vld [vmem:[%s3242_s3 + $0x80] ss:$8 sps:$4 sm:$0xff]  }
  0x1f   :  { %790 = vmatprep.subr.bf16.mxu1 %v2456_v22  ;;  %v2477_v39 = vld [vmem:[%s3242_s3 + $0x94] ss:$8 sps:$4 sm:$0xff]   ;;  %v2438_v40 = vld [vmem:[%s3239_s0 + $0x20] sm:$0xff]   ;;  %v2479_v41 = vld [vmem:[%s3242_s3 + $0x90] ss:$8 sps:$4 sm:$0xff]  }
  0x20   :  { %v2480_v42 = vld [vmem:[%s3242_s3 + $0xa4] ss:$8 sps:$4 sm:$0xff]   ;;  %v2482_v43 = vld [vmem:[%s3242_s3 + $0xa0] ss:$8 sps:$4 sm:$0xff]   ;;  %v2483_v44 = vld [vmem:[%s3242_s3 + $0xb4] ss:$8 sps:$4 sm:$0xff]  }
  0x21   :  { %300 = vmatpush1.bf16.msra.mxu0 %v2421_v8  ;;  %v2439_v45 = vld [vmem:[%s3239_s0 + $0x28] sm:$0xff]   ;;  %v2485_v46 = vld [vmem:[%s3242_s3 + $0xb0] ss:$8 sps:$4 sm:$0xff]   ;;  %v2489_v49 = vld [vmem:[%s3242_s3 + $0xd4] ss:$8 sps:$4 sm:$0xff]  }
  0x22   :  { %301 = vmatprep.subr.bf16.mxu0 %v2422_v9  ;;  %791 = vmatpush1.bf16.msra.mxu1 %v2458_v23  ;;  %v2486_v47 = vld [vmem:[%s3242_s3 + $0xc4] ss:$8 sps:$4 sm:$0xff]   ;;  %v2488_v48 = vld [vmem:[%s3242_s3 + $0xc0] ss:$8 sps:$4 sm:$0xff]   ;;  %v2440_v50 = vld [vmem:[%s3239_s0 + $0x30] sm:$0xff]  }
  0x23   :  { %792 = vmatprep.subr.bf16.mxu1 %v2459_v24  ;;  %v2441_v51 = vld [vmem:[%s3239_s0 + $0x38] sm:$0xff]   ;;  %v2442_v52 = vld [vmem:[%s3239_s0 + $0x40] sm:$0xff]   ;;  %v2443_v53 = vld [vmem:[%s3239_s0 + $0x48] sm:$0xff]  }
  0x24   :  { %v2444_v54 = vld [vmem:[%s3239_s0 + $0x50] sm:$0xff]   ;;  %v2445_v56 = vld [vmem:[%s3239_s0 + $0x58] sm:$0xff]   ;;  %v2492_v57 = vld [vmem:[%s3242_s3 + $0xe4] ss:$8 sps:$4 sm:$0xff]  }
  0x25   :  { %302 = vmatpush1.bf16.msra.mxu0 %v2424_v10  ;;  %v2491_v55 = vld [vmem:[%s3242_s3 + $0xd0] ss:$8 sps:$4 sm:$0xff]   ;;  %v2494_v58 = vld [vmem:[%s3242_s3 + $0xe0] ss:$8 sps:$4 sm:$0xff]   ;;  %v2495_v59 = vld [vmem:[%s3242_s3 + $0xf4] ss:$8 sps:$4 sm:$0xff]  }
  0x26   :  { %303 = vmatprep.subr.bf16.mxu0 %v2425_v11  ;;  %793 = vmatpush1.bf16.msra.mxu1 %v2461_v26  ;;  %v2497_v60 = vld [vmem:[%s3242_s3 + $0xf0] ss:$8 sps:$4 sm:$0xff]   ;;  %v2446_v61 = vld [vmem:[%s3239_s0 + $0x60] sm:$0xff]   ;;  %v2447_v62 = vld [vmem:[%s3239_s0 + $0x68] sm:$0xff]  }
  0x27   :  { %794 = vmatprep.subr.bf16.mxu1 %v2462_v27  ;;  %v2448_v63 = vld [vmem:[%s3239_s0 + $0x70] sm:$0xff]   ;;  %v2449_v1 = vld [vmem:[%s3239_s0 + $0x78] sm:$0xff]   ;;  %v105_v5 = vld [vmem:[%s3241_s2] sm:$0x3] }
  0x28   :  { %v2856_v7 = vrot.slane %v105_v5, %v109_v4  ;;  %v2500_v17 = vld [vmem:[%s3244_s5 + $0x48] sm:$0xff]  }
  0x29   :  { %304 = vmatpush1.bf16.msra.mxu0 %v2427_v12  ;;  %v2501_v23 = vld [vmem:[%s3244_s5 + $0x8] sm:$0xff]  }
  0x2a   :  { %305 = vmatprep.subr.bf16.mxu0 %v2428_v13  ;;  %795 = vmatpush1.bf16.msra.mxu1 %v2464_v28  ;;  %v2515_v3 = vld [vmem:[%s3246_s7 + $0x8] sm:$0xff]  }
  0x2b   :  { %796 = vmatprep.subr.bf16.mxu1 %v2465_v29 }
  0x2d   :  { %306 = vmatpush1.bf16.msra.mxu0 %v2430_v14 }
  0x2e   :  { %307 = vmatprep.subr.bf16.mxu0 %v2431_v15  ;;  %797 = vmatpush1.bf16.msra.mxu1 %v2467_v31  ;;  %v2498_v15 = vld [vmem:[%s3244_s5 + $0x40] sm:$0xff]  }
  0x2f   :  { %798 = vmatprep.subr.bf16.mxu1 %v2468_v32  ;;  %v2503_v32 = vld [vmem:[%s3244_s5 + $0x10] sm:$0xff]  }
  0x31   :  { %308 = vmatpush1.bf16.msra.mxu0 %v2433_v16  ;;  %v2499_v16 = vld [vmem:[%s3244_s5] sm:$0xff]  }
  0x32   :  { %799 = vmatpush1.bf16.msra.mxu1 %v2470_v33  ;;  %2133 = vmatprep.subr.bf16.mxu0 %v2498_v15 }
  0x33   :  { %800 = vmatprep.subr.bf16.mxu1 %v2471_v34 }
  0x34   :  { %326 = vmatmul.mubr.bf16.vlgmr.msra.gmra.mrb[0].mxu0 %v2434_v20 }
  0x35   :  { %335 = vmatprep.mubr.bf16.mxu0 %v2555_v0  ;;  %2134 = vmatpush3.bf16.msra.mxu0 %v2499_v16 }
  0x36   :  { %801 = vmatpush1.bf16.msra.mxu1 %v2473_v36  ;;  %2135 = vmatprep.subr.bf16.mxu0 %v2500_v17 }
  0x37   :  { %802 = vmatprep.subr.bf16.mxu1 %v2474_v37 }
  0x39   :  { %2136 = vmatpush3.bf16.msra.mxu0 %v2501_v23 }
  0x3a   :  { %803 = vmatpush1.bf16.msra.mxu1 %v2476_v38 }
  0x3b   :  { %804 = vmatprep.subr.bf16.mxu1 %v2477_v39 }
  0x3c   :  { %336 = vmatmul.mubr.bf16.gmra.mrb[4].mxu0 %v2435_v25  ;;  %v2502_v25 = vld [vmem:[%s3244_s5 + $0x50] sm:$0xff]  }
  0x3d   :  { %345 = vmatprep.mubr.bf16.mxu0 %v2555_v0  ;;  %2137 = vmatprep.subr.bf16.mxu0 %v2502_v25 }
  0x3e   :  { %805 = vmatpush1.bf16.msra.mxu1 %v2479_v41  ;;  %2138 = vmatpush3.bf16.msra.mxu0 %v2503_v32  ;;  %v2505_v41 = vld [vmem:[%s3244_s5 + $0x18] sm:$0xff]  }
  0x3f   :  { %806 = vmatprep.subr.bf16.mxu1 %v2480_v42 }
  0x42   :  { %807 = vmatpush1.bf16.msra.mxu1 %v2482_v43  ;;  %v2506_v43 = vld [vmem:[%s3244_s5 + $0x60] sm:$0xff]  }
  0x43   :  { %808 = vmatprep.subr.bf16.mxu1 %v2483_v44 }
  0x44   :  { %346 = vmatmul.mubr.bf16.gmra.mrb[8].mxu0 %v2436_v30 }
  0x45   :  { %355 = vmatprep.mubr.bf16.mxu0 %v2555_v0 }
  0x46   :  { %809 = vmatpush1.bf16.msra.mxu1 %v2485_v46 }
  0x47   :  { %810 = vmatprep.subr.bf16.mxu1 %v2486_v47 }
  0x4a   :  { %811 = vmatpush1.bf16.msra.mxu1 %v2488_v48 }
  0x4b   :  { %812 = vmatprep.subr.bf16.mxu1 %v2489_v49 }
  0x4c   :  { %356 = vmatmul.mubr.bf16.gmra.mrb[12].mxu0 %v2437_v35  ;;  %v2504_v35 = vld [vmem:[%s3244_s5 + $0x58] sm:$0xff]  }
  0x4d   :  { %365 = vmatprep.mubr.bf16.mxu0 %v2555_v0  ;;  %2139 = vmatprep.subr.bf16.mxu0 %v2504_v35 }
  0x4e   :  { %813 = vmatpush1.bf16.msra.mxu1 %v2491_v55  ;;  %2140 = vmatpush3.bf16.msra.mxu0 %v2505_v41 }
  0x4f   :  { %814 = vmatprep.subr.bf16.mxu1 %v2492_v57  ;;  %2141 = vmatprep.subr.bf16.mxu0 %v2506_v43 }
  0x52   :  { %815 = vmatpush1.bf16.msra.mxu1 %v2494_v58 }
  0x53   :  { %816 = vmatprep.subr.bf16.mxu1 %v2495_v59 }
  0x54   :  { %366 = vmatmul.mubr.bf16.gmra.mrb[16].mxu0 %v2438_v40 }
  0x55   :  { %375 = vmatprep.mubr.bf16.mxu0 %v2555_v0 }
  0x56   :  { %817 = vmatpush1.bf16.msra.mxu1 %v2497_v60 }
  0x5c   :  { %376 = vmatmul.mubr.bf16.gmra.mrb[20].mxu0 %v2439_v45 }
  0x5d   :  { %385 = vmatprep.mubr.bf16.mxu0 %v2555_v0 }
  0x64   :  { %386 = vmatmul.mubr.bf16.gmra.mrb[24].mxu0 %v2440_v50  ;;  %v2507_v50 = vld [vmem:[%s3244_s5 + $0x20] sm:$0xff]  }
  0x65   :  { %395 = vmatprep.mubr.bf16.mxu0 %v2555_v0  ;;  %2142 = vmatpush3.bf16.msra.mxu0 %v2507_v50 }
  0x6c   :  { %396 = vmatmul.mubr.bf16.gmra.mrb[28].mxu0 %v2441_v51 }
  0x6d   :  { %405 = vmatprep.mubr.bf16.mxu0 %v2555_v0 }
  0x74   :  { %406 = vmatmul.mubr.bf16.gmra.mrb[32].mxu0 %v2442_v52 }
  0x75   :  { %415 = vmatprep.mubr.bf16.mxu0 %v2555_v0 }
  0x7c   :  { %416 = vmatmul.mubr.bf16.gmra.mrb[36].mxu0 %v2443_v53  ;;  %v2508_v53 = vld [vmem:[%s3244_s5 + $0x68] sm:$0xff]  }
  0x7d   :  { %425 = vmatprep.mubr.bf16.mxu0 %v2555_v0  ;;  %2143 = vmatprep.subr.bf16.mxu0 %v2508_v53 }
  0x84   :  { %426 = vmatmul.mubr.bf16.gmra.mrb[40].mxu0 %v2444_v54 }
  0x85   :  { %435 = vmatprep.mubr.bf16.mxu0 %v2555_v0 }
  0x8c   :  { %436 = vmatmul.mubr.bf16.gmra.mrb[44].mxu0 %v2445_v56 }
  0x8d   :  { %445 = vmatprep.mubr.bf16.mxu0 %v2555_v0 }
  0x94   :  { %446 = vmatmul.mubr.bf16.gmra.mrb[48].mxu0 %v2446_v61 }
  0x95   :  { %455 = vmatprep.mubr.bf16.mxu0 %v2555_v0 }
  0x9c   :  { %456 = vmatmul.mubr.bf16.gmra.mrb[52].mxu0 %v2447_v62 }
  0x9d   :  { %465 = vmatprep.mubr.bf16.mxu0 %v2555_v0 }
  0xa4   :  { %466 = vmatmul.mubr.bf16.gmra.mrb[56].mxu0 %v2448_v63 }
  0xa5   :  { %475 = vmatprep.mubr.bf16.mxu0 %v2555_v0  ;;  %v2860_v0 = vrot.slane %v105_v5, %v113_v6 }
  0xac   :  { %476 = vmatmul.mubr.bf16.gmra.mrb[60].mxu0 %v2449_v1 }
 0x107   :  { %v327_v8 = vpop.f32.mrb[0].mxu0 }
 0x108   :  { %v328_v9 = vadd.f32 %v327_v8, %v2856_v7  ;;  %v329_v10 = vpop.f32.mrb[1].mxu0 }
 0x109   :  { %v330_v11 = vadd.f32 %v329_v10, %v2860_v0  ;;  %v331_v12 = vpop.f32.mrb[2].mxu0 }
 0x10a   :  { %v332_v13 = vadd.f32 %v331_v12, %v2856_v7  ;;  %v333_v14 = vpop.f32.mrb[3].mxu0  ;;  %v486_v19 = vmax.f32 %v328_v9, 0.0 }
 0x10b   :  { %v334_v18 = vadd.f32 %v333_v14, %v2860_v0  ;;  %v487_v21 = vmax.f32 %v330_v11, 0.0 }
 0x10c   :  { %v488_v20 = vmax.f32 %v332_v13, 0.0 }
 0x10d   :  { %v489_v22 = vmax.f32 %v334_v18, 0.0 }
 0x10e   :  { %v550_v24 = vpack.c.bf16 %v488_v20, %v486_v19 }
 0x10f   :  { %v337_v26 = vpop.f32.mrb[4].mxu0  ;;  %v551_v27 = vpack.c.bf16 %v489_v22, %v487_v21 }
 0x110   :  { %v338_v28 = vadd.f32 %v337_v26, %v2856_v7  ;;  %v339_v29 = vpop.f32.mrb[5].mxu0 }
 0x111   :  { %v340_v30 = vadd.f32 %v339_v29, %v2860_v0  ;;  %v341_v31 = vpop.f32.mrb[6].mxu0  ;;  %818 = vmatprep.mubr.bf16.mxu1 %v551_v27 }
 0x112   :  { %v342_v33 = vadd.f32 %v341_v31, %v2856_v7  ;;  %v343_v34 = vpop.f32.mrb[7].mxu0  ;;  %819 = vmatmul.mubr.bf16.vlgmr.msra.gmra.mrb[0].mxu1 %v550_v24  ;;  %v490_v37 = vmax.f32 %v338_v28, 0.0 }
 0x113   :  { %v344_v36 = vadd.f32 %v343_v34, %v2860_v0  ;;  %v491_v39 = vmax.f32 %v340_v30, 0.0 }
 0x114   :  { %v492_v38 = vmax.f32 %v342_v33, 0.0 }
 0x115   :  { %v493_v40 = vmax.f32 %v344_v36, 0.0 }
 0x116   :  { %v552_v42 = vpack.c.bf16 %v492_v38, %v490_v37 }
 0x117   :  { %v553_v44 = vpack.c.bf16 %v493_v40, %v491_v39  ;;  %v347_v45 = vpop.f32.mrb[8].mxu0 }
 0x118   :  { %v348_v46 = vadd.f32 %v347_v45, %v2856_v7  ;;  %v349_v47 = vpop.f32.mrb[9].mxu0 }
 0x119   :  { %v350_v48 = vadd.f32 %v349_v47, %v2860_v0  ;;  %v351_v49 = vpop.f32.mrb[10].mxu0  ;;  %828 = vmatprep.mubr.bf16.mxu1 %v553_v44 }
 0x11a   :  { %v352_v51 = vadd.f32 %v351_v49, %v2856_v7  ;;  %v353_v52 = vpop.f32.mrb[11].mxu0  ;;  %829 = vmatmul.mubr.bf16.gmra.mrb[4].mxu1 %v552_v42  ;;  %v494_v55 = vmax.f32 %v348_v46, 0.0 }
 0x11b   :  { %v354_v54 = vadd.f32 %v353_v52, %v2860_v0  ;;  %v495_v57 = vmax.f32 %v350_v48, 0.0 }
 0x11c   :  { %v496_v56 = vmax.f32 %v352_v51, 0.0 }
 0x11d   :  { %v497_v58 = vmax.f32 %v354_v54, 0.0 }
 0x11e   :  { %v554_v59 = vpack.c.bf16 %v496_v56, %v494_v55 }
 0x11f   :  { %v555_v60 = vpack.c.bf16 %v497_v58, %v495_v57  ;;  %v357_v61 = vpop.f32.mrb[12].mxu0 }
 0x120   :  { %v358_v62 = vadd.f32 %v357_v61, %v2856_v7  ;;  %v359_v63 = vpop.f32.mrb[13].mxu0 }
 0x121   :  { %v360_v1 = vadd.f32 %v359_v63, %v2860_v0  ;;  %v361_v2 = vpop.f32.mrb[14].mxu0  ;;  %838 = vmatprep.mubr.bf16.mxu1 %v555_v60 }
 0x122   :  { %v362_v5 = vadd.f32 %v361_v2, %v2856_v7  ;;  %v363_v8 = vpop.f32.mrb[15].mxu0  ;;  %839 = vmatmul.mubr.bf16.gmra.mrb[8].mxu1 %v554_v59  ;;  %v498_v10 = vmax.f32 %v358_v62, 0.0 }
 0x123   :  { %v364_v9 = vadd.f32 %v363_v8, %v2860_v0  ;;  %v499_v12 = vmax.f32 %v360_v1, 0.0 }
 0x124   :  { %v500_v11 = vmax.f32 %v362_v5, 0.0 }
 0x125   :  { %v501_v13 = vmax.f32 %v364_v9, 0.0 }
 0x126   :  { %v556_v14 = vpack.c.bf16 %v500_v11, %v498_v10 }
 0x127   :  { %v557_v15 = vpack.c.bf16 %v501_v13, %v499_v12  ;;  %v367_v16 = vpop.f32.mrb[16].mxu0 }
 0x128   :  { %v368_v17 = vadd.f32 %v367_v16, %v2856_v7  ;;  %v369_v18 = vpop.f32.mrb[17].mxu0 }
 0x129   :  { %v370_v19 = vadd.f32 %v369_v18, %v2860_v0  ;;  %v371_v20 = vpop.f32.mrb[18].mxu0  ;;  %848 = vmatprep.mubr.bf16.mxu1 %v557_v15 }
 0x12a   :  { %v372_v21 = vadd.f32 %v371_v20, %v2856_v7  ;;  %v373_v22 = vpop.f32.mrb[19].mxu0  ;;  %849 = vmatmul.mubr.bf16.gmra.mrb[12].mxu1 %v556_v14  ;;  %v502_v24 = vmax.f32 %v368_v17, 0.0 }
 0x12b   :  { %v374_v23 = vadd.f32 %v373_v22, %v2860_v0  ;;  %v503_v26 = vmax.f32 %v370_v19, 0.0 }
 0x12c   :  { %v504_v25 = vmax.f32 %v372_v21, 0.0 }
 0x12d   :  { %v505_v27 = vmax.f32 %v374_v23, 0.0 }
 0x12e   :  { %v558_v28 = vpack.c.bf16 %v504_v25, %v502_v24 }
 0x12f   :  { %v559_v29 = vpack.c.bf16 %v505_v27, %v503_v26  ;;  %v377_v30 = vpop.f32.mrb[20].mxu0 }
 0x130   :  { %v378_v31 = vadd.f32 %v377_v30, %v2856_v7  ;;  %v379_v32 = vpop.f32.mrb[21].mxu0 }
 0x131   :  { %v380_v33 = vadd.f32 %v379_v32, %v2860_v0  ;;  %v381_v34 = vpop.f32.mrb[22].mxu0  ;;  %858 = vmatprep.mubr.bf16.mxu1 %v559_v29 }
 0x132   :  { %v382_v35 = vadd.f32 %v381_v34, %v2856_v7  ;;  %v383_v36 = vpop.f32.mrb[23].mxu0  ;;  %859 = vmatmul.mubr.bf16.gmra.mrb[16].mxu1 %v558_v28  ;;  %v506_v38 = vmax.f32 %v378_v31, 0.0 }
 0x133   :  { %v384_v37 = vadd.f32 %v383_v36, %v2860_v0  ;;  %v507_v40 = vmax.f32 %v380_v33, 0.0 }
 0x134   :  { %v508_v39 = vmax.f32 %v382_v35, 0.0 }
 0x135   :  { %v509_v41 = vmax.f32 %v384_v37, 0.0 }
 0x136   :  { %v560_v42 = vpack.c.bf16 %v508_v39, %v506_v38 }
 0x137   :  { %v561_v43 = vpack.c.bf16 %v509_v41, %v507_v40  ;;  %v387_v44 = vpop.f32.mrb[24].mxu0 }
 0x138   :  { %v388_v45 = vadd.f32 %v387_v44, %v2856_v7  ;;  %v389_v46 = vpop.f32.mrb[25].mxu0 }
 0x139   :  { %v390_v47 = vadd.f32 %v389_v46, %v2860_v0  ;;  %v391_v48 = vpop.f32.mrb[26].mxu0  ;;  %868 = vmatprep.mubr.bf16.mxu1 %v561_v43 }
 0x13a   :  { %v392_v49 = vadd.f32 %v391_v48, %v2856_v7  ;;  %v393_v50 = vpop.f32.mrb[27].mxu0  ;;  %869 = vmatmul.mubr.bf16.gmra.mrb[20].mxu1 %v560_v42  ;;  %v510_v52 = vmax.f32 %v388_v45, 0.0 }
 0x13b   :  { %v394_v51 = vadd.f32 %v393_v50, %v2860_v0  ;;  %v511_v54 = vmax.f32 %v390_v47, 0.0 }
 0x13c   :  { %v512_v53 = vmax.f32 %v392_v49, 0.0 }
 0x13d   :  { %v513_v55 = vmax.f32 %v394_v51, 0.0 }
 0x13e   :  { %v562_v56 = vpack.c.bf16 %v512_v53, %v510_v52 }
 0x13f   :  { %v563_v57 = vpack.c.bf16 %v513_v55, %v511_v54  ;;  %v397_v58 = vpop.f32.mrb[28].mxu0 }
 0x140   :  { %v398_v59 = vadd.f32 %v397_v58, %v2856_v7  ;;  %v399_v60 = vpop.f32.mrb[29].mxu0 }
 0x141   :  { %v400_v61 = vadd.f32 %v399_v60, %v2860_v0  ;;  %v401_v62 = vpop.f32.mrb[30].mxu0  ;;  %878 = vmatprep.mubr.bf16.mxu1 %v563_v57 }
 0x142   :  { %v402_v63 = vadd.f32 %v401_v62, %v2856_v7  ;;  %v403_v1 = vpop.f32.mrb[31].mxu0  ;;  %879 = vmatmul.mubr.bf16.gmra.mrb[24].mxu1 %v562_v56  ;;  %v514_v5 = vmax.f32 %v398_v59, 0.0 }
 0x143   :  { %v404_v2 = vadd.f32 %v403_v1, %v2860_v0  ;;  %v515_v9 = vmax.f32 %v400_v61, 0.0 }
 0x144   :  { %v516_v8 = vmax.f32 %v402_v63, 0.0  ;;  %v2509_v63 = vld [vmem:[%s3244_s5 + $0x28] sm:$0xff]  }
 0x145   :  { %v517_v10 = vmax.f32 %v404_v2, 0.0  ;;  %2144 = vmatpush3.bf16.msra.mxu0 %v2509_v63 }
 0x146   :  { %v564_v11 = vpack.c.bf16 %v516_v8, %v514_v5 }
 0x147   :  { %v565_v12 = vpack.c.bf16 %v517_v10, %v515_v9  ;;  %v407_v13 = vpop.f32.mrb[32].mxu0  ;;  %v2510_v10 = vld [vmem:[%s3244_s5 + $0x70] sm:$0xff]  }
 0x148   :  { %v408_v14 = vadd.f32 %v407_v13, %v2856_v7  ;;  %v409_v15 = vpop.f32.mrb[33].mxu0  ;;  %v2511_v13 = vld [vmem:[%s3244_s5 + $0x30] sm:$0xff]   ;;  %2145 = vmatprep.subr.bf16.mxu0 %v2510_v10 }
 0x149   :  { %v410_v16 = vadd.f32 %v409_v15, %v2860_v0  ;;  %v411_v17 = vpop.f32.mrb[34].mxu0  ;;  %888 = vmatprep.mubr.bf16.mxu1 %v565_v12  ;;  %2146 = vmatpush3.bf16.msra.mxu0 %v2511_v13 }
 0x14a   :  { %v412_v18 = vadd.f32 %v411_v17, %v2856_v7  ;;  %v413_v19 = vpop.f32.mrb[35].mxu0  ;;  %889 = vmatmul.mubr.bf16.gmra.mrb[28].mxu1 %v564_v11  ;;  %v518_v21 = vmax.f32 %v408_v14, 0.0 }
 0x14b   :  { %v414_v20 = vadd.f32 %v413_v19, %v2860_v0  ;;  %v519_v23 = vmax.f32 %v410_v16, 0.0 }
 0x14c   :  { %v520_v22 = vmax.f32 %v412_v18, 0.0 }
 0x14d   :  { %v521_v24 = vmax.f32 %v414_v20, 0.0  ;;  %v2512_v20 = vld [vmem:[%s3244_s5 + $0x78] sm:$0xff]  }
 0x14e   :  { %v566_v25 = vpack.c.bf16 %v520_v22, %v518_v21  ;;  %v2513_v22 = vld [vmem:[%s3244_s5 + $0x38] sm:$0xff]   ;;  %2147 = vmatprep.subr.bf16.mxu0 %v2512_v20  ;;  %v2514_v20 = vld [vmem:[%s3246_s7] sm:$0xff]  }
 0x14f   :  { %v567_v26 = vpack.c.bf16 %v521_v24, %v519_v23  ;;  %v417_v27 = vpop.f32.mrb[36].mxu0  ;;  %2148 = vmatpush3.bf16.msra.mxu0 %v2513_v22  ;;  %2311 = vmatprep.subr.bf16.mxu1 %v2514_v20 }
 0x150   :  { %v418_v28 = vadd.f32 %v417_v27, %v2856_v7  ;;  %v419_v29 = vpop.f32.mrb[37].mxu0  ;;  %2312 = vmatpush3.bf16.msra.mxu1 %v2514_v20 }
 0x151   :  { %v420_v30 = vadd.f32 %v419_v29, %v2860_v0  ;;  %v421_v31 = vpop.f32.mrb[38].mxu0  ;;  %898 = vmatprep.mubr.bf16.mxu1 %v567_v26  ;;  %2313 = vmatprep.subr.bf16.mxu1 %v2515_v3 }
 0x152   :  { %v422_v32 = vadd.f32 %v421_v31, %v2856_v7  ;;  %v423_v33 = vpop.f32.mrb[39].mxu0  ;;  %899 = vmatmul.mubr.bf16.gmra.mrb[32].mxu1 %v566_v25  ;;  %v522_v35 = vmax.f32 %v418_v28, 0.0 }
 0x153   :  { %v424_v34 = vadd.f32 %v423_v33, %v2860_v0  ;;  %v523_v37 = vmax.f32 %v420_v30, 0.0 }
 0x154   :  { %v524_v36 = vmax.f32 %v422_v32, 0.0  ;;  %2314 = vmatpush3.bf16.msra.mxu1 %v2515_v3 }
 0x155   :  { %v525_v38 = vmax.f32 %v424_v34, 0.0 }
 0x156   :  { %v568_v39 = vpack.c.bf16 %v524_v36, %v522_v35 }
 0x157   :  { %v569_v40 = vpack.c.bf16 %v525_v38, %v523_v37  ;;  %v427_v41 = vpop.f32.mrb[40].mxu0 }
 0x158   :  { %v428_v42 = vadd.f32 %v427_v41, %v2856_v7  ;;  %v429_v43 = vpop.f32.mrb[41].mxu0 }
 0x159   :  { %v430_v44 = vadd.f32 %v429_v43, %v2860_v0  ;;  %v431_v45 = vpop.f32.mrb[42].mxu0  ;;  %908 = vmatprep.mubr.bf16.mxu1 %v569_v40 }
 0x15a   :  { %v432_v46 = vadd.f32 %v431_v45, %v2856_v7  ;;  %v433_v47 = vpop.f32.mrb[43].mxu0  ;;  %909 = vmatmul.mubr.bf16.gmra.mrb[36].mxu1 %v568_v39  ;;  %v526_v49 = vmax.f32 %v428_v42, 0.0 }
 0x15b   :  { %v434_v48 = vadd.f32 %v433_v47, %v2860_v0  ;;  %v527_v51 = vmax.f32 %v430_v44, 0.0 }
 0x15c   :  { %v528_v50 = vmax.f32 %v432_v46, 0.0 }
 0x15d   :  { %v529_v52 = vmax.f32 %v434_v48, 0.0 }
 0x15e   :  { %v570_v53 = vpack.c.bf16 %v528_v50, %v526_v49 }
 0x15f   :  { %v571_v54 = vpack.c.bf16 %v529_v52, %v527_v51  ;;  %v437_v55 = vpop.f32.mrb[44].mxu0 }
 0x160   :  { %v438_v56 = vadd.f32 %v437_v55, %v2856_v7  ;;  %v439_v57 = vpop.f32.mrb[45].mxu0 }
 0x161   :  { %v440_v58 = vadd.f32 %v439_v57, %v2860_v0  ;;  %v441_v59 = vpop.f32.mrb[46].mxu0  ;;  %918 = vmatprep.mubr.bf16.mxu1 %v571_v54 }
 0x162   :  { %v442_v60 = vadd.f32 %v441_v59, %v2856_v7  ;;  %v443_v61 = vpop.f32.mrb[47].mxu0  ;;  %919 = vmatmul.mubr.bf16.gmra.mrb[40].mxu1 %v570_v53  ;;  %v530_v1 = vmax.f32 %v438_v56, 0.0 }
 0x163   :  { %v444_v62 = vadd.f32 %v443_v61, %v2860_v0  ;;  %v531_v5 = vmax.f32 %v440_v58, 0.0 }
 0x164   :  { %v532_v2 = vmax.f32 %v442_v60, 0.0 }
 0x165   :  { %v533_v8 = vmax.f32 %v444_v62, 0.0 }
 0x166   :  { %v572_v9 = vpack.c.bf16 %v532_v2, %v530_v1 }
 0x167   :  { %v573_v11 = vpack.c.bf16 %v533_v8, %v531_v5  ;;  %v447_v12 = vpop.f32.mrb[48].mxu0 }
 0x168   :  { %v448_v14 = vadd.f32 %v447_v12, %v2856_v7  ;;  %v449_v15 = vpop.f32.mrb[49].mxu0  ;;  %v614_v12 = vld [vmem:[%s3243_s4] sm:$0x3] }
 0x169   :  { %v450_v16 = vadd.f32 %v449_v15, %v2860_v0  ;;  %v451_v17 = vpop.f32.mrb[50].mxu0  ;;  %928 = vmatprep.mubr.bf16.mxu1 %v573_v11  ;;  %v2979_v13 = vrot.slane %v614_v12, %v109_v4 }
 0x16a   :  { %v452_v18 = vadd.f32 %v451_v17, %v2856_v7  ;;  %v453_v19 = vpop.f32.mrb[51].mxu0  ;;  %929 = vmatmul.mubr.bf16.gmra.mrb[44].mxu1 %v572_v9  ;;  %v534_v23 = vmax.f32 %v448_v14, 0.0 }
 0x16b   :  { %v454_v21 = vadd.f32 %v453_v19, %v2860_v0  ;;  %v535_v25 = vmax.f32 %v450_v16, 0.0 }
 0x16c   :  { %v536_v24 = vmax.f32 %v452_v18, 0.0 }
 0x16d   :  { %v537_v26 = vmax.f32 %v454_v21, 0.0 }
 0x16e   :  { %v574_v27 = vpack.c.bf16 %v536_v24, %v534_v23 }
 0x16f   :  { %v575_v28 = vpack.c.bf16 %v537_v26, %v535_v25  ;;  %v457_v29 = vpop.f32.mrb[52].mxu0  ;;  %v2516_v25 = vld [vmem:[%s3246_s7 + $0x10] sm:$0xff]  }
 0x170   :  { %v458_v30 = vadd.f32 %v457_v29, %v2856_v7  ;;  %v459_v31 = vpop.f32.mrb[53].mxu0  ;;  %2315 = vmatprep.subr.bf16.mxu1 %v2516_v25 }
 0x171   :  { %v460_v32 = vadd.f32 %v459_v31, %v2860_v0  ;;  %v461_v33 = vpop.f32.mrb[54].mxu0  ;;  %938 = vmatprep.mubr.bf16.mxu1 %v575_v28  ;;  %2316 = vmatpush3.bf16.msra.mxu1 %v2516_v25 }
 0x172   :  { %v462_v34 = vadd.f32 %v461_v33, %v2856_v7  ;;  %v463_v35 = vpop.f32.mrb[55].mxu0  ;;  %939 = vmatmul.mubr.bf16.gmra.mrb[48].mxu1 %v574_v27  ;;  %v538_v37 = vmax.f32 %v458_v30, 0.0 }
 0x173   :  { %v464_v36 = vadd.f32 %v463_v35, %v2860_v0  ;;  %v539_v39 = vmax.f32 %v460_v32, 0.0 }
 0x174   :  { %v540_v38 = vmax.f32 %v462_v34, 0.0 }
 0x175   :  { %v541_v40 = vmax.f32 %v464_v36, 0.0 }
 0x176   :  { %v576_v41 = vpack.c.bf16 %v540_v38, %v538_v37 }
 0x177   :  { %v577_v42 = vpack.c.bf16 %v541_v40, %v539_v39  ;;  %v467_v43 = vpop.f32.mrb[56].mxu0 }
 0x178   :  { %v468_v44 = vadd.f32 %v467_v43, %v2856_v7  ;;  %v469_v45 = vpop.f32.mrb[57].mxu0 }
 0x179   :  { %v470_v46 = vadd.f32 %v469_v45, %v2860_v0  ;;  %v471_v47 = vpop.f32.mrb[58].mxu0  ;;  %948 = vmatprep.mubr.bf16.mxu1 %v577_v42 }
 0x17a   :  { %v472_v48 = vadd.f32 %v471_v47, %v2856_v7  ;;  %v473_v49 = vpop.f32.mrb[59].mxu0  ;;  %949 = vmatmul.mubr.bf16.gmra.mrb[52].mxu1 %v576_v41  ;;  %v542_v51 = vmax.f32 %v468_v44, 0.0 }
 0x17b   :  { %v474_v50 = vadd.f32 %v473_v49, %v2860_v0  ;;  %v543_v53 = vmax.f32 %v470_v46, 0.0 }
 0x17c   :  { %v544_v52 = vmax.f32 %v472_v48, 0.0 }
 0x17d   :  { %v545_v54 = vmax.f32 %v474_v50, 0.0 }
 0x17e   :  { %v578_v55 = vpack.c.bf16 %v544_v52, %v542_v51 }
 0x17f   :  { %v579_v56 = vpack.c.bf16 %v545_v54, %v543_v53  ;;  %v477_v57 = vpop.f32.mrb[60].mxu0 }
 0x180   :  { %v478_v58 = vadd.f32 %v477_v57, %v2856_v7  ;;  %v479_v59 = vpop.f32.mrb[61].mxu0 }
 0x181   :  { %v480_v60 = vadd.f32 %v479_v59, %v2860_v0  ;;  %v481_v61 = vpop.f32.mrb[62].mxu0  ;;  %958 = vmatprep.mubr.bf16.mxu1 %v579_v56 }
 0x182   :  { %v482_v62 = vadd.f32 %v481_v61, %v2856_v7  ;;  %v483_v63 = vpop.f32.mrb[63].mxu0  ;;  %959 = vmatmul.mubr.bf16.gmra.mrb[56].mxu1 %v578_v55  ;;  %v546_v2 = vmax.f32 %v478_v58, 0.0  ;;  %v2983_v7 = vrot.slane %v614_v12, %v113_v6 }
 0x183   :  { %v484_v1 = vadd.f32 %v483_v63, %v2860_v0  ;;  %v547_v8 = vmax.f32 %v480_v60, 0.0 }
 0x184   :  { %v548_v5 = vmax.f32 %v482_v62, 0.0 }
 0x185   :  { %v549_v9 = vmax.f32 %v484_v1, 0.0 }
 0x186   :  { %v580_v10 = vpack.c.bf16 %v548_v5, %v546_v2 }
 0x187   :  { %v581_v11 = vpack.c.bf16 %v549_v9, %v547_v8 }
 0x189   :  { %968 = vmatprep.mubr.bf16.mxu1 %v581_v11 }
 0x18a   :  { %969 = vmatmul.mubr.bf16.gmra.mrb[60].mxu1 %v580_v10 }
 0x1e5   :  { %v820_v0 = vpop.f32.mrb[0].mxu1 }
 0x1e6   :  { %v821_v14 = vadd.f32 %v820_v0, %v2979_v13  ;;  %v822_v15 = vpop.f32.mrb[1].mxu1 }
 0x1e7   :  { %v823_v16 = vadd.f32 %v822_v15, %v2983_v7  ;;  %v824_v17 = vpop.f32.mrb[2].mxu1 }
 0x1e8   :  { %v825_v18 = vadd.f32 %v824_v17, %v2979_v13  ;;  %v826_v19 = vpop.f32.mrb[3].mxu1  ;;  %v979_v6 = vmax.f32 %v821_v14, 0.0 }
 0x1e9   :  { %v827_v4 = vadd.f32 %v826_v19, %v2983_v7  ;;  %v980_v22 = vmax.f32 %v823_v16, 0.0 }
 0x1ea   :  { %v981_v21 = vmax.f32 %v825_v18, 0.0 }
 0x1eb   :  { %v982_v23 = vmax.f32 %v827_v4, 0.0 }
 0x1ec   :  { %v1043_v24 = vpack.c.bf16 %v981_v21, %v979_v6 }
 0x1ed   :  { %v1044_v26 = vpack.c.bf16 %v982_v23, %v980_v22  ;;  %v830_v27 = vpop.f32.mrb[4].mxu1 }
 0x1ee   :  { %v831_v28 = vadd.f32 %v830_v27, %v2979_v13  ;;  %v832_v29 = vpop.f32.mrb[5].mxu1 }
 0x1ef   :  { %v833_v30 = vadd.f32 %v832_v29, %v2983_v7  ;;  %v834_v31 = vpop.f32.mrb[6].mxu1  ;;  %1242 = vmatprep.mubr.bf16.mxu0 %v1044_v26 }
 0x1f0   :  { %v835_v32 = vadd.f32 %v834_v31, %v2979_v13  ;;  %v836_v33 = vpop.f32.mrb[7].mxu1  ;;  %1243 = vmatmul.mubr.bf16.vlgmr.msra.gmra.mrb[64].mxu0 %v1043_v24  ;;  %v983_v35 = vmax.f32 %v831_v28, 0.0 }
 0x1f1   :  { %v837_v34 = vadd.f32 %v836_v33, %v2983_v7  ;;  %v984_v37 = vmax.f32 %v833_v30, 0.0 }
 0x1f2   :  { %v985_v36 = vmax.f32 %v835_v32, 0.0 }
 0x1f3   :  { %v986_v38 = vmax.f32 %v837_v34, 0.0 }
 0x1f4   :  { %v1045_v39 = vpack.c.bf16 %v985_v36, %v983_v35 }
 0x1f5   :  { %v1046_v40 = vpack.c.bf16 %v986_v38, %v984_v37  ;;  %v840_v41 = vpop.f32.mrb[8].mxu1 }
 0x1f6   :  { %v841_v42 = vadd.f32 %v840_v41, %v2979_v13  ;;  %v842_v43 = vpop.f32.mrb[9].mxu1 }
 0x1f7   :  { %v843_v44 = vadd.f32 %v842_v43, %v2983_v7  ;;  %v844_v45 = vpop.f32.mrb[10].mxu1  ;;  %1250 = vmatprep.mubr.bf16.mxu0 %v1046_v40 }
 0x1f8   :  { %v845_v46 = vadd.f32 %v844_v45, %v2979_v13  ;;  %v846_v47 = vpop.f32.mrb[11].mxu1  ;;  %1251 = vmatmul.mubr.bf16.gmra.mrb[68].mxu0 %v1045_v39  ;;  %v987_v49 = vmax.f32 %v841_v42, 0.0 }
 0x1f9   :  { %v847_v48 = vadd.f32 %v846_v47, %v2983_v7  ;;  %v988_v51 = vmax.f32 %v843_v44, 0.0 }
 0x1fa   :  { %v989_v50 = vmax.f32 %v845_v46, 0.0 }
 0x1fb   :  { %v990_v52 = vmax.f32 %v847_v48, 0.0 }
 0x1fc   :  { %v1047_v53 = vpack.c.bf16 %v989_v50, %v987_v49 }
 0x1fd   :  { %v1048_v54 = vpack.c.bf16 %v990_v52, %v988_v51  ;;  %v850_v55 = vpop.f32.mrb[12].mxu1 }
 0x1fe   :  { %v851_v56 = vadd.f32 %v850_v55, %v2979_v13  ;;  %v852_v57 = vpop.f32.mrb[13].mxu1 }
 0x1ff   :  { %v853_v58 = vadd.f32 %v852_v57, %v2983_v7  ;;  %v854_v59 = vpop.f32.mrb[14].mxu1  ;;  %1258 = vmatprep.mubr.bf16.mxu0 %v1048_v54 }
 0x200   :  { %v855_v60 = vadd.f32 %v854_v59, %v2979_v13  ;;  %v856_v61 = vpop.f32.mrb[15].mxu1  ;;  %1259 = vmatmul.mubr.bf16.gmra.mrb[72].mxu0 %v1047_v53  ;;  %v991_v63 = vmax.f32 %v851_v56, 0.0 }
 0x201   :  { %v857_v62 = vadd.f32 %v856_v61, %v2983_v7  ;;  %v992_v2 = vmax.f32 %v853_v58, 0.0 }
 0x202   :  { %v993_v1 = vmax.f32 %v855_v60, 0.0 }
 0x203   :  { %v994_v5 = vmax.f32 %v857_v62, 0.0 }
 0x204   :  { %v1049_v8 = vpack.c.bf16 %v993_v1, %v991_v63 }
 0x205   :  { %v1050_v9 = vpack.c.bf16 %v994_v5, %v992_v2  ;;  %v860_v10 = vpop.f32.mrb[16].mxu1 }
 0x206   :  { %v861_v11 = vadd.f32 %v860_v10, %v2979_v13  ;;  %v862_v12 = vpop.f32.mrb[17].mxu1 }
 0x207   :  { %v863_v0 = vadd.f32 %v862_v12, %v2983_v7  ;;  %v864_v14 = vpop.f32.mrb[18].mxu1  ;;  %1266 = vmatprep.mubr.bf16.mxu0 %v1050_v9 }
 0x208   :  { %v865_v15 = vadd.f32 %v864_v14, %v2979_v13  ;;  %v866_v16 = vpop.f32.mrb[19].mxu1  ;;  %1267 = vmatmul.mubr.bf16.gmra.mrb[76].mxu0 %v1049_v8  ;;  %v995_v18 = vmax.f32 %v861_v11, 0.0 }
 0x209   :  { %v867_v17 = vadd.f32 %v866_v16, %v2983_v7  ;;  %v996_v20 = vmax.f32 %v863_v0, 0.0 }
 0x20a   :  { %v997_v19 = vmax.f32 %v865_v15, 0.0 }
 0x20b   :  { %v998_v3 = vmax.f32 %v867_v17, 0.0 }
 0x20c   :  { %v1051_v4 = vpack.c.bf16 %v997_v19, %v995_v18 }
 0x20d   :  { %v1052_v6 = vpack.c.bf16 %v998_v3, %v996_v20  ;;  %v870_v21 = vpop.f32.mrb[20].mxu1 }
 0x20e   :  { %v871_v22 = vadd.f32 %v870_v21, %v2979_v13  ;;  %v872_v23 = vpop.f32.mrb[21].mxu1 }
 0x20f   :  { %v873_v24 = vadd.f32 %v872_v23, %v2983_v7  ;;  %v874_v25 = vpop.f32.mrb[22].mxu1  ;;  %1274 = vmatprep.mubr.bf16.mxu0 %v1052_v6 }
 0x210   :  { %v875_v26 = vadd.f32 %v874_v25, %v2979_v13  ;;  %v876_v27 = vpop.f32.mrb[23].mxu1  ;;  %1275 = vmatmul.mubr.bf16.gmra.mrb[80].mxu0 %v1051_v4  ;;  %v999_v29 = vmax.f32 %v871_v22, 0.0 }
 0x211   :  { %v877_v28 = vadd.f32 %v876_v27, %v2983_v7  ;;  %v1000_v31 = vmax.f32 %v873_v24, 0.0 }
 0x212   :  { %v1001_v30 = vmax.f32 %v875_v26, 0.0 }
 0x213   :  { %v1002_v32 = vmax.f32 %v877_v28, 0.0 }
 0x214   :  { %v1053_v33 = vpack.c.bf16 %v1001_v30, %v999_v29 }
 0x215   :  { %v1054_v34 = vpack.c.bf16 %v1002_v32, %v1000_v31  ;;  %v880_v35 = vpop.f32.mrb[24].mxu1 }
 0x216   :  { %v881_v36 = vadd.f32 %v880_v35, %v2979_v13  ;;  %v882_v37 = vpop.f32.mrb[25].mxu1 }
 0x217   :  { %v883_v38 = vadd.f32 %v882_v37, %v2983_v7  ;;  %v884_v39 = vpop.f32.mrb[26].mxu1  ;;  %1282 = vmatprep.mubr.bf16.mxu0 %v1054_v34 }
 0x218   :  { %v885_v40 = vadd.f32 %v884_v39, %v2979_v13  ;;  %v886_v41 = vpop.f32.mrb[27].mxu1  ;;  %1283 = vmatmul.mubr.bf16.gmra.mrb[84].mxu0 %v1053_v33  ;;  %v1003_v43 = vmax.f32 %v881_v36, 0.0 }
 0x219   :  { %v887_v42 = vadd.f32 %v886_v41, %v2983_v7  ;;  %v1004_v45 = vmax.f32 %v883_v38, 0.0 }
 0x21a   :  { %v1005_v44 = vmax.f32 %v885_v40, 0.0 }
 0x21b   :  { %v1006_v46 = vmax.f32 %v887_v42, 0.0 }
 0x21c   :  { %v1055_v47 = vpack.c.bf16 %v1005_v44, %v1003_v43 }
 0x21d   :  { %v1056_v48 = vpack.c.bf16 %v1006_v46, %v1004_v45  ;;  %v890_v49 = vpop.f32.mrb[28].mxu1 }
 0x21e   :  { %v891_v50 = vadd.f32 %v890_v49, %v2979_v13  ;;  %v892_v51 = vpop.f32.mrb[29].mxu1 }
 0x21f   :  { %v893_v52 = vadd.f32 %v892_v51, %v2983_v7  ;;  %v894_v53 = vpop.f32.mrb[30].mxu1  ;;  %1290 = vmatprep.mubr.bf16.mxu0 %v1056_v48  ;;  %v2517_v51 = vld [vmem:[%s3246_s7 + $0x18] sm:$0xff]  }
 0x220   :  { %v895_v54 = vadd.f32 %v894_v53, %v2979_v13  ;;  %v896_v55 = vpop.f32.mrb[31].mxu1  ;;  %1291 = vmatmul.mubr.bf16.gmra.mrb[88].mxu0 %v1055_v47  ;;  %v1007_v57 = vmax.f32 %v891_v50, 0.0  ;;  %2317 = vmatprep.subr.bf16.mxu1 %v2517_v51 }
 0x221   :  { %v897_v56 = vadd.f32 %v896_v55, %v2983_v7  ;;  %v1008_v59 = vmax.f32 %v893_v52, 0.0  ;;  %2318 = vmatpush3.bf16.msra.mxu1 %v2517_v51 }
 0x222   :  { %v1009_v58 = vmax.f32 %v895_v54, 0.0 }
 0x223   :  { %v1010_v60 = vmax.f32 %v897_v56, 0.0 }
 0x224   :  { %v1057_v61 = vpack.c.bf16 %v1009_v58, %v1007_v57 }
 0x225   :  { %v1058_v62 = vpack.c.bf16 %v1010_v60, %v1008_v59  ;;  %v900_v63 = vpop.f32.mrb[32].mxu1  ;;  %v2518_v59 = vld [vmem:[%s3246_s7 + $0x20] sm:$0xff]  }
 0x226   :  { %v901_v1 = vadd.f32 %v900_v63, %v2979_v13  ;;  %v902_v2 = vpop.f32.mrb[33].mxu1  ;;  %2319 = vmatprep.subr.bf16.mxu1 %v2518_v59 }
 0x227   :  { %v903_v5 = vadd.f32 %v902_v2, %v2983_v7  ;;  %v904_v8 = vpop.f32.mrb[34].mxu1  ;;  %1298 = vmatprep.mubr.bf16.mxu0 %v1058_v62  ;;  %2320 = vmatpush3.bf16.msra.mxu1 %v2518_v59 }
 0x228   :  { %v905_v9 = vadd.f32 %v904_v8, %v2979_v13  ;;  %v906_v10 = vpop.f32.mrb[35].mxu1  ;;  %1299 = vmatmul.mubr.bf16.gmra.mrb[92].mxu0 %v1057_v61  ;;  %v1011_v12 = vmax.f32 %v901_v1, 0.0  ;;  %v2519_v8 = vld [vmem:[%s3246_s7 + $0x28] sm:$0xff]  }
 0x229   :  { %v907_v11 = vadd.f32 %v906_v10, %v2983_v7  ;;  %v1012_v14 = vmax.f32 %v903_v5, 0.0  ;;  %2321 = vmatprep.subr.bf16.mxu1 %v2519_v8 }
 0x22a   :  { %v1013_v0 = vmax.f32 %v905_v9, 0.0 }
 0x22b   :  { %v1014_v15 = vmax.f32 %v907_v11, 0.0  ;;  %2322 = vmatpush3.bf16.msra.mxu1 %v2519_v8 }
 0x22c   :  { %v1059_v16 = vpack.c.bf16 %v1013_v0, %v1011_v12 }
 0x22d   :  { %v1060_v17 = vpack.c.bf16 %v1014_v15, %v1012_v14  ;;  %v910_v18 = vpop.f32.mrb[36].mxu1 }
 0x22e   :  { %v911_v19 = vadd.f32 %v910_v18, %v2979_v13  ;;  %v912_v20 = vpop.f32.mrb[37].mxu1 }
 0x22f   :  { %v913_v3 = vadd.f32 %v912_v20, %v2983_v7  ;;  %v914_v4 = vpop.f32.mrb[38].mxu1  ;;  %1306 = vmatprep.mubr.bf16.mxu0 %v1060_v17 }
 0x230   :  { %v915_v6 = vadd.f32 %v914_v4, %v2979_v13  ;;  %v916_v21 = vpop.f32.mrb[39].mxu1  ;;  %1307 = vmatmul.mubr.bf16.gmra.mrb[96].mxu0 %v1059_v16  ;;  %v1015_v23 = vmax.f32 %v911_v19, 0.0  ;;  %v2520_v16 = vld [vmem:[%s3246_s7 + $0x30] sm:$0xff]  }
 0x231   :  { %v917_v22 = vadd.f32 %v916_v21, %v2983_v7  ;;  %v1016_v25 = vmax.f32 %v913_v3, 0.0  ;;  %2323 = vmatprep.subr.bf16.mxu1 %v2520_v16  ;;  %v2521_v21 = vld [vmem:[%s3246_s7 + $0x38] sm:$0xff]  }
 0x232   :  { %v1017_v24 = vmax.f32 %v915_v6, 0.0  ;;  %2324 = vmatpush3.bf16.msra.mxu1 %v2520_v16 }
 0x233   :  { %v1018_v26 = vmax.f32 %v917_v22, 0.0  ;;  %2325 = vmatprep.subr.bf16.mxu1 %v2521_v21 }
 0x234   :  { %v1061_v27 = vpack.c.bf16 %v1017_v24, %v1015_v23 }
 0x235   :  { %v1062_v28 = vpack.c.bf16 %v1018_v26, %v1016_v25  ;;  %v920_v29 = vpop.f32.mrb[40].mxu1 }
 0x236   :  { %v921_v30 = vadd.f32 %v920_v29, %v2979_v13  ;;  %v922_v31 = vpop.f32.mrb[41].mxu1  ;;  %2326 = vmatpush3.bf16.msra.mxu1 %v2521_v21 }
 0x237   :  { %v923_v32 = vadd.f32 %v922_v31, %v2983_v7  ;;  %v924_v33 = vpop.f32.mrb[42].mxu1  ;;  %1314 = vmatprep.mubr.bf16.mxu0 %v1062_v28 }
 0x238   :  { %v925_v34 = vadd.f32 %v924_v33, %v2979_v13  ;;  %v926_v35 = vpop.f32.mrb[43].mxu1  ;;  %1315 = vmatmul.mubr.bf16.gmra.mrb[100].mxu0 %v1061_v27  ;;  %v1019_v37 = vmax.f32 %v921_v30, 0.0 }
 0x239   :  { %v927_v36 = vadd.f32 %v926_v35, %v2983_v7  ;;  %v1020_v39 = vmax.f32 %v923_v32, 0.0 }
 0x23a   :  { %v1021_v38 = vmax.f32 %v925_v34, 0.0 }
 0x23b   :  { %v1022_v40 = vmax.f32 %v927_v36, 0.0 }
 0x23c   :  { %v1063_v41 = vpack.c.bf16 %v1021_v38, %v1019_v37 }
 0x23d   :  { %v1064_v42 = vpack.c.bf16 %v1022_v40, %v1020_v39  ;;  %v930_v43 = vpop.f32.mrb[44].mxu1 }
 0x23e   :  { %v931_v44 = vadd.f32 %v930_v43, %v2979_v13  ;;  %v932_v45 = vpop.f32.mrb[45].mxu1 }
 0x23f   :  { %v933_v46 = vadd.f32 %v932_v45, %v2983_v7  ;;  %v934_v47 = vpop.f32.mrb[46].mxu1  ;;  %1322 = vmatprep.mubr.bf16.mxu0 %v1064_v42 }
 0x240   :  { %v935_v48 = vadd.f32 %v934_v47, %v2979_v13  ;;  %v936_v49 = vpop.f32.mrb[47].mxu1  ;;  %1323 = vmatmul.mubr.bf16.gmra.mrb[104].mxu0 %v1063_v41  ;;  %v1023_v52 = vmax.f32 %v931_v44, 0.0 }
 0x241   :  { %v937_v50 = vadd.f32 %v936_v49, %v2983_v7  ;;  %v1024_v54 = vmax.f32 %v933_v46, 0.0 }
 0x242   :  { %v1025_v53 = vmax.f32 %v935_v48, 0.0 }
 0x243   :  { %v1026_v55 = vmax.f32 %v937_v50, 0.0 }
 0x244   :  { %v1065_v56 = vpack.c.bf16 %v1025_v53, %v1023_v52 }
 0x245   :  { %v1066_v57 = vpack.c.bf16 %v1026_v55, %v1024_v54  ;;  %v940_v58 = vpop.f32.mrb[48].mxu1 }
 0x246   :  { %v941_v60 = vadd.f32 %v940_v58, %v2979_v13  ;;  %v942_v61 = vpop.f32.mrb[49].mxu1 }
 0x247   :  { %v943_v62 = vadd.f32 %v942_v61, %v2983_v7  ;;  %v944_v63 = vpop.f32.mrb[50].mxu1  ;;  %1330 = vmatprep.mubr.bf16.mxu0 %v1066_v57  ;;  %v3076_v57 = vld [vmem:[%s3245_s6] ss:$0 sm:$0xff] }
 0x248   :  { %v945_v1 = vadd.f32 %v944_v63, %v2979_v13  ;;  %v946_v2 = vpop.f32.mrb[51].mxu1  ;;  %1331 = vmatmul.mubr.bf16.gmra.mrb[108].mxu0 %v1065_v56  ;;  %v1027_v9 = vmax.f32 %v941_v60, 0.0 }
 0x249   :  { %v947_v5 = vadd.f32 %v946_v2, %v2983_v7  ;;  %v1028_v11 = vmax.f32 %v943_v62, 0.0  ;;  %v2522_v62 = vld [vmem:[%s3248_s9] sm:$0xff]  }
 0x24a   :  { %v1029_v10 = vmax.f32 %v945_v1, 0.0  ;;  %2359 = vmatprep.subr.bf16.mxu1 %v2522_v62 }
 0x24b   :  { %v1030_v12 = vmax.f32 %v947_v5, 0.0 }
 0x24c   :  { %v1067_v0 = vpack.c.bf16 %v1029_v10, %v1027_v9 }
 0x24d   :  { %v1068_v14 = vpack.c.bf16 %v1030_v12, %v1028_v11  ;;  %v950_v15 = vpop.f32.mrb[52].mxu1 }
 0x24e   :  { %v951_v17 = vadd.f32 %v950_v15, %v2979_v13  ;;  %v952_v18 = vpop.f32.mrb[53].mxu1 }
 0x24f   :  { %v953_v19 = vadd.f32 %v952_v18, %v2983_v7  ;;  %v954_v20 = vpop.f32.mrb[54].mxu1  ;;  %1338 = vmatprep.mubr.bf16.mxu0 %v1068_v14 }
 0x250   :  { %v955_v3 = vadd.f32 %v954_v20, %v2979_v13  ;;  %v956_v4 = vpop.f32.mrb[55].mxu1  ;;  %1339 = vmatmul.mubr.bf16.gmra.mrb[112].mxu0 %v1067_v0  ;;  %v1031_v22 = vmax.f32 %v951_v17, 0.0 }
 0x251   :  { %v957_v6 = vadd.f32 %v956_v4, %v2983_v7  ;;  %v1032_v24 = vmax.f32 %v953_v19, 0.0 }
 0x252   :  { %v1033_v23 = vmax.f32 %v955_v3, 0.0 }
 0x253   :  { %v1034_v25 = vmax.f32 %v957_v6, 0.0  ;;  %v2523_v6 = vld [vmem:[%s3248_s9 + $0x8] sm:$0xff]  }
 0x254   :  { %v1069_v26 = vpack.c.bf16 %v1033_v23, %v1031_v22 }
 0x255   :  { %v1070_v27 = vpack.c.bf16 %v1034_v25, %v1032_v24  ;;  %v960_v28 = vpop.f32.mrb[56].mxu1  ;;  %v2524_v25 = vld [vmem:[%s3248_s9 + $0x10] sm:$0xff]  }
 0x256   :  { %v961_v29 = vadd.f32 %v960_v28, %v2979_v13  ;;  %v962_v30 = vpop.f32.mrb[57].mxu1 }
 0x257   :  { %v963_v31 = vadd.f32 %v962_v30, %v2983_v7  ;;  %v964_v32 = vpop.f32.mrb[58].mxu1  ;;  %1346 = vmatprep.mubr.bf16.mxu0 %v1070_v27 }
 0x258   :  { %v965_v33 = vadd.f32 %v964_v32, %v2979_v13  ;;  %v966_v34 = vpop.f32.mrb[59].mxu1  ;;  %1347 = vmatmul.mubr.bf16.gmra.mrb[116].mxu0 %v1069_v26  ;;  %v1035_v36 = vmax.f32 %v961_v29, 0.0 }
 0x259   :  { %v967_v35 = vadd.f32 %v966_v34, %v2983_v7  ;;  %v1036_v38 = vmax.f32 %v963_v31, 0.0 }
 0x25a   :  { %v1037_v37 = vmax.f32 %v965_v33, 0.0  ;;  %v2525_v33 = vld [vmem:[%s3248_s9 + $0x18] sm:$0xff]  }
 0x25b   :  { %v1038_v39 = vmax.f32 %v967_v35, 0.0 }
 0x25c   :  { %v1071_v40 = vpack.c.bf16 %v1037_v37, %v1035_v36 }
 0x25d   :  { %v1072_v41 = vpack.c.bf16 %v1038_v39, %v1036_v38  ;;  %v970_v42 = vpop.f32.mrb[60].mxu1  ;;  %v2526_v38 = vld [vmem:[%s3248_s9 + $0x20] sm:$0xff]  }
 0x25e   :  { %v971_v43 = vadd.f32 %v970_v42, %v2979_v13  ;;  %v972_v44 = vpop.f32.mrb[61].mxu1 }
 0x25f   :  { %v973_v45 = vadd.f32 %v972_v44, %v2983_v7  ;;  %v974_v46 = vpop.f32.mrb[62].mxu1  ;;  %1354 = vmatprep.mubr.bf16.mxu0 %v1072_v41 }
 0x260   :  { %v975_v47 = vadd.f32 %v974_v46, %v2979_v13  ;;  %v976_v48 = vpop.f32.mrb[63].mxu1  ;;  %1355 = vmatmul.mubr.bf16.gmra.mrb[120].mxu0 %v1071_v40  ;;  %v1039_v50 = vmax.f32 %v971_v43, 0.0  ;;  %v2527_v46 = vld [vmem:[%s3248_s9 + $0x28] sm:$0xff]  }
 0x261   :  { %v977_v49 = vadd.f32 %v976_v48, %v2983_v7  ;;  %v1040_v52 = vmax.f32 %v973_v45, 0.0 }
 0x262   :  { %v1041_v51 = vmax.f32 %v975_v47, 0.0 }
 0x263   :  { %v1042_v53 = vmax.f32 %v977_v49, 0.0 }
 0x264   :  { %v1073_v54 = vpack.c.bf16 %v1041_v51, %v1039_v50 }
 0x265   :  { %v1074_v55 = vpack.c.bf16 %v1042_v53, %v1040_v52 }
 0x267   :  { %1362 = vmatprep.mubr.bf16.mxu0 %v1074_v55 }
 0x268   :  { %1363 = vmatmul.mubr.bf16.gmra.mrb[124].mxu0 %v1073_v54 }
 0x2c3   :  { %v2149_v56 = vpop.f32.mrb[64].mxu0 }
 0x2c4   :  { %v2150_v58 = vpop.f32.mrb[65].mxu0 }
 0x2c5   :  { %v2151_v13 = vadd.f32 %v2150_v58, %v2149_v56  ;;  %v2152_v59 = vpop.f32.mrb[66].mxu0 }
 0x2c6   :  { %v2153_v60 = vpop.f32.mrb[67].mxu0 }
 0x2c7   :  { %v1245_v7 = vadd.f32 %v2151_v13, %v3076_v57  ;;  %v2154_v61 = vadd.f32 %v2153_v60, %v2152_v59 }
 0x2c9   :  { %v1248_v63 = vadd.f32 %v2154_v61, %v3076_v57  ;;  %v1371_v1 = vmax.f32 %v1245_v7, 0.0 }
 0x2cb   :  { %v1372_v2 = vmax.f32 %v1248_v63, 0.0  ;;  %v2155_v5 = vpop.f32.mrb[68].mxu0 }
 0x2cc   :  { %v2156_v8 = vpop.f32.mrb[69].mxu0 }
 0x2cd   :  { %v2157_v9 = vadd.f32 %v2156_v8, %v2155_v5  ;;  %v2158_v10 = vpop.f32.mrb[70].mxu0  ;;  %v1403_v11 = vpack.c.bf16 %v1372_v2, %v1371_v1 }
 0x2ce   :  { %v2159_v12 = vpop.f32.mrb[71].mxu0 }
 0x2cf   :  { %v1253_v0 = vadd.f32 %v2157_v9, %v3076_v57  ;;  %v2160_v14 = vadd.f32 %v2159_v12, %v2158_v10  ;;  %2327 = vmatprep.mubr.bf16.mxu1 %v1403_v11 }
 0x2d1   :  { %v1256_v15 = vadd.f32 %v2160_v14, %v3076_v57  ;;  %v1373_v16 = vmax.f32 %v1253_v0, 0.0 }
 0x2d3   :  { %v1374_v17 = vmax.f32 %v1256_v15, 0.0  ;;  %v2161_v18 = vpop.f32.mrb[72].mxu0 }
 0x2d4   :  { %v2162_v19 = vpop.f32.mrb[73].mxu0 }
 0x2d5   :  { %v1404_v20 = vpack.c.bf16 %v1374_v17, %v1373_v16  ;;  %v2163_v3 = vadd.f32 %v2162_v19, %v2161_v18  ;;  %v2164_v4 = vpop.f32.mrb[74].mxu0 }
 0x2d6   :  { %v2165_v21 = vpop.f32.mrb[75].mxu0 }
 0x2d7   :  { %v1261_v22 = vadd.f32 %v2163_v3, %v3076_v57  ;;  %v2166_v23 = vadd.f32 %v2165_v21, %v2164_v4  ;;  %2328 = vmatmul.mubr.bf16.vlgmr.msra.gmra.mrb[64].mxu1 %v1404_v20 }
 0x2d8   :  { %2360 = vmatpush3.bf16.msra.mxu1 %v2522_v62 }
 0x2d9   :  { %v1264_v24 = vadd.f32 %v2166_v23, %v3076_v57  ;;  %2361 = vmatprep.subr.bf16.mxu1 %v2523_v6  ;;  %v1375_v26 = vmax.f32 %v1261_v22, 0.0 }
 0x2db   :  { %v1376_v27 = vmax.f32 %v1264_v24, 0.0  ;;  %v2167_v28 = vpop.f32.mrb[76].mxu0 }
 0x2dc   :  { %v2168_v29 = vpop.f32.mrb[77].mxu0  ;;  %2362 = vmatpush3.bf16.msra.mxu1 %v2523_v6 }
 0x2dd   :  { %v2169_v30 = vadd.f32 %v2168_v29, %v2167_v28  ;;  %v2170_v31 = vpop.f32.mrb[78].mxu0  ;;  %v1405_v32 = vpack.c.bf16 %v1376_v27, %v1375_v26  ;;  %2363 = vmatprep.subr.bf16.mxu1 %v2524_v25 }
 0x2de   :  { %v2171_v34 = vpop.f32.mrb[79].mxu0 }
 0x2df   :  { %v1269_v35 = vadd.f32 %v2169_v30, %v3076_v57  ;;  %v2172_v36 = vadd.f32 %v2171_v34, %v2170_v31  ;;  %2331 = vmatprep.mubr.bf16.mxu1 %v1405_v32 }
 0x2e0   :  { %2364 = vmatpush3.bf16.msra.mxu1 %v2524_v25 }
 0x2e1   :  { %v1272_v37 = vadd.f32 %v2172_v36, %v3076_v57  ;;  %2365 = vmatprep.subr.bf16.mxu1 %v2525_v33  ;;  %v1377_v39 = vmax.f32 %v1269_v35, 0.0 }
 0x2e3   :  { %v1378_v40 = vmax.f32 %v1272_v37, 0.0  ;;  %v2173_v41 = vpop.f32.mrb[80].mxu0 }
 0x2e4   :  { %v2174_v42 = vpop.f32.mrb[81].mxu0  ;;  %2366 = vmatpush3.bf16.msra.mxu1 %v2525_v33 }
 0x2e5   :  { %v2175_v43 = vadd.f32 %v2174_v42, %v2173_v41  ;;  %v2176_v44 = vpop.f32.mrb[82].mxu0  ;;  %v1406_v45 = vpack.c.bf16 %v1378_v40, %v1377_v39  ;;  %2367 = vmatprep.subr.bf16.mxu1 %v2526_v38 }
 0x2e6   :  { %v2177_v47 = vpop.f32.mrb[83].mxu0 }
 0x2e7   :  { %v1277_v48 = vadd.f32 %v2175_v43, %v3076_v57  ;;  %v2178_v49 = vadd.f32 %v2177_v47, %v2176_v44  ;;  %2332 = vmatmul.mubr.bf16.gmra.mrb[68].mxu1 %v1406_v45 }
 0x2e8   :  { %2368 = vmatpush3.bf16.msra.mxu1 %v2526_v38 }
 0x2e9   :  { %v1280_v50 = vadd.f32 %v2178_v49, %v3076_v57  ;;  %2369 = vmatprep.subr.bf16.mxu1 %v2527_v46  ;;  %v1379_v51 = vmax.f32 %v1277_v48, 0.0 }
 0x2eb   :  { %v1380_v52 = vmax.f32 %v1280_v50, 0.0  ;;  %v2179_v53 = vpop.f32.mrb[84].mxu0 }
 0x2ec   :  { %v2180_v54 = vpop.f32.mrb[85].mxu0  ;;  %2370 = vmatpush3.bf16.msra.mxu1 %v2527_v46 }
 0x2ed   :  { %v2181_v55 = vadd.f32 %v2180_v54, %v2179_v53  ;;  %v2182_v56 = vpop.f32.mrb[86].mxu0  ;;  %v1407_v58 = vpack.c.bf16 %v1380_v52, %v1379_v51 }
 0x2ee   :  { %v2183_v13 = vpop.f32.mrb[87].mxu0 }
 0x2ef   :  { %v1285_v59 = vadd.f32 %v2181_v55, %v3076_v57  ;;  %v2184_v60 = vadd.f32 %v2183_v13, %v2182_v56  ;;  %2335 = vmatprep.mubr.bf16.mxu1 %v1407_v58 }
 0x2f1   :  { %v1288_v7 = vadd.f32 %v2184_v60, %v3076_v57  ;;  %v1381_v61 = vmax.f32 %v1285_v59, 0.0 }
 0x2f3   :  { %v1382_v62 = vmax.f32 %v1288_v7, 0.0  ;;  %v2185_v63 = vpop.f32.mrb[88].mxu0 }
 0x2f4   :  { %v2186_v1 = vpop.f32.mrb[89].mxu0 }
 0x2f5   :  { %v2187_v2 = vadd.f32 %v2186_v1, %v2185_v63  ;;  %v2188_v5 = vpop.f32.mrb[90].mxu0  ;;  %v1408_v8 = vpack.c.bf16 %v1382_v62, %v1381_v61 }
 0x2f6   :  { %v2189_v9 = vpop.f32.mrb[91].mxu0 }
 0x2f7   :  { %v1293_v10 = vadd.f32 %v2187_v2, %v3076_v57  ;;  %v2190_v11 = vadd.f32 %v2189_v9, %v2188_v5  ;;  %2336 = vmatmul.mubr.bf16.gmra.mrb[72].mxu1 %v1408_v8 }
 0x2f9   :  { %v1296_v12 = vadd.f32 %v2190_v11, %v3076_v57  ;;  %v1383_v0 = vmax.f32 %v1293_v10, 0.0 }
 0x2fb   :  { %v1384_v14 = vmax.f32 %v1296_v12, 0.0  ;;  %v2191_v15 = vpop.f32.mrb[92].mxu0 }
 0x2fc   :  { %v2192_v16 = vpop.f32.mrb[93].mxu0 }
 0x2fd   :  { %v2193_v17 = vadd.f32 %v2192_v16, %v2191_v15  ;;  %v2194_v18 = vpop.f32.mrb[94].mxu0  ;;  %v1409_v19 = vpack.c.bf16 %v1384_v14, %v1383_v0 }
 0x2fe   :  { %v2195_v20 = vpop.f32.mrb[95].mxu0 }
 0x2ff   :  { %v1301_v3 = vadd.f32 %v2193_v17, %v3076_v57  ;;  %v2196_v4 = vadd.f32 %v2195_v20, %v2194_v18  ;;  %2339 = vmatprep.mubr.bf16.mxu1 %v1409_v19  ;;  %v2528_v19 = vld [vmem:[%s3248_s9 + $0x30] sm:$0xff]  }
 0x300   :  { %2371 = vmatprep.subr.bf16.mxu1 %v2528_v19 }
 0x301   :  { %v1304_v6 = vadd.f32 %v2196_v4, %v3076_v57  ;;  %v1385_v21 = vmax.f32 %v1301_v3, 0.0  ;;  %2372 = vmatpush3.bf16.msra.mxu1 %v2528_v19 }
 0x303   :  { %v1386_v22 = vmax.f32 %v1304_v6, 0.0  ;;  %v2197_v23 = vpop.f32.mrb[96].mxu0 }
 0x304   :  { %v2198_v24 = vpop.f32.mrb[97].mxu0 }
 0x305   :  { %v2199_v25 = vadd.f32 %v2198_v24, %v2197_v23  ;;  %v2200_v26 = vpop.f32.mrb[98].mxu0  ;;  %v1410_v27 = vpack.c.bf16 %v1386_v22, %v1385_v21  ;;  %v2529_v24 = vld [vmem:[%s3248_s9 + $0x38] sm:$0xff]  }
 0x306   :  { %v2201_v28 = vpop.f32.mrb[99].mxu0  ;;  %2373 = vmatprep.subr.bf16.mxu1 %v2529_v24 }
 0x307   :  { %v1309_v29 = vadd.f32 %v2199_v25, %v3076_v57  ;;  %v2202_v30 = vadd.f32 %v2201_v28, %v2200_v26  ;;  %2340 = vmatmul.mubr.bf16.gmra.mrb[76].mxu1 %v1410_v27 }
 0x308   :  { %2374 = vmatpush3.bf16.msra.mxu1 %v2529_v24 }
 0x309   :  { %v1312_v31 = vadd.f32 %v2202_v30, %v3076_v57  ;;  %v1387_v32 = vmax.f32 %v1309_v29, 0.0 }
 0x30b   :  { %v1388_v33 = vmax.f32 %v1312_v31, 0.0  ;;  %v2203_v34 = vpop.f32.mrb[100].mxu0 }
 0x30c   :  { %v2204_v35 = vpop.f32.mrb[101].mxu0 }
 0x30d   :  { %v2205_v36 = vadd.f32 %v2204_v35, %v2203_v34  ;;  %v2206_v37 = vpop.f32.mrb[102].mxu0  ;;  %v1411_v38 = vpack.c.bf16 %v1388_v33, %v1387_v32 }
 0x30e   :  { %v2207_v39 = vpop.f32.mrb[103].mxu0 }
 0x30f   :  { %v1317_v40 = vadd.f32 %v2205_v36, %v3076_v57  ;;  %v2208_v41 = vadd.f32 %v2207_v39, %v2206_v37  ;;  %2343 = vmatprep.mubr.bf16.mxu1 %v1411_v38 }
 0x311   :  { %v1320_v42 = vadd.f32 %v2208_v41, %v3076_v57  ;;  %v1389_v43 = vmax.f32 %v1317_v40, 0.0 }
 0x313   :  { %v1390_v44 = vmax.f32 %v1320_v42, 0.0  ;;  %v2209_v45 = vpop.f32.mrb[104].mxu0 }
 0x314   :  { %v2210_v46 = vpop.f32.mrb[105].mxu0 }
 0x315   :  { %v1412_v47 = vpack.c.bf16 %v1390_v44, %v1389_v43  ;;  %v2211_v48 = vadd.f32 %v2210_v46, %v2209_v45  ;;  %v2212_v49 = vpop.f32.mrb[106].mxu0 }
 0x316   :  { %v2213_v50 = vpop.f32.mrb[107].mxu0 }
 0x317   :  { %2344 = vmatmul.mubr.bf16.gmra.mrb[80].mxu1 %v1412_v47  ;;  %v1325_v51 = vadd.f32 %v2211_v48, %v3076_v57  ;;  %v2214_v52 = vadd.f32 %v2213_v50, %v2212_v49 }
 0x319   :  { %v1328_v53 = vadd.f32 %v2214_v52, %v3076_v57  ;;  %v1391_v54 = vmax.f32 %v1325_v51, 0.0  ;;  %v3137_v51 = vld [vmem:[%s3247_s8] ss:$0 sm:$0xff] }
 0x31b   :  { %v1392_v55 = vmax.f32 %v1328_v53, 0.0  ;;  %v2215_v56 = vpop.f32.mrb[108].mxu0 }
 0x31c   :  { %v2216_v58 = vpop.f32.mrb[109].mxu0 }
 0x31d   :  { %v2217_v13 = vadd.f32 %v2216_v58, %v2215_v56  ;;  %v2218_v59 = vpop.f32.mrb[110].mxu0  ;;  %v1413_v60 = vpack.c.bf16 %v1392_v55, %v1391_v54 }
 0x31e   :  { %v2219_v7 = vpop.f32.mrb[111].mxu0 }
 0x31f   :  { %v1333_v61 = vadd.f32 %v2217_v13, %v3076_v57  ;;  %v2220_v62 = vadd.f32 %v2219_v7, %v2218_v59  ;;  %2347 = vmatprep.mubr.bf16.mxu1 %v1413_v60 }
 0x321   :  { %v1336_v63 = vadd.f32 %v2220_v62, %v3076_v57  ;;  %v1393_v1 = vmax.f32 %v1333_v61, 0.0 }
 0x323   :  { %v1394_v2 = vmax.f32 %v1336_v63, 0.0  ;;  %v2221_v5 = vpop.f32.mrb[112].mxu0 }
 0x324   :  { %v2222_v8 = vpop.f32.mrb[113].mxu0 }
 0x325   :  { %v1414_v9 = vpack.c.bf16 %v1394_v2, %v1393_v1  ;;  %v2223_v10 = vadd.f32 %v2222_v8, %v2221_v5  ;;  %v2224_v11 = vpop.f32.mrb[114].mxu0 }
 0x326   :  { %v2225_v12 = vpop.f32.mrb[115].mxu0 }
 0x327   :  { %2348 = vmatmul.mubr.bf16.gmra.mrb[84].mxu1 %v1414_v9  ;;  %v1341_v0 = vadd.f32 %v2223_v10, %v3076_v57  ;;  %v2226_v14 = vadd.f32 %v2225_v12, %v2224_v11 }
 0x329   :  { %v1344_v15 = vadd.f32 %v2226_v14, %v3076_v57  ;;  %v1395_v16 = vmax.f32 %v1341_v0, 0.0 }
 0x32b   :  { %v1396_v17 = vmax.f32 %v1344_v15, 0.0  ;;  %v2227_v18 = vpop.f32.mrb[116].mxu0 }
 0x32c   :  { %v2228_v20 = vpop.f32.mrb[117].mxu0 }
 0x32d   :  { %v2229_v3 = vadd.f32 %v2228_v20, %v2227_v18  ;;  %v2230_v4 = vpop.f32.mrb[118].mxu0  ;;  %v1415_v6 = vpack.c.bf16 %v1396_v17, %v1395_v16 }
 0x32e   :  { %v2231_v21 = vpop.f32.mrb[119].mxu0 }
 0x32f   :  { %v1349_v22 = vadd.f32 %v2229_v3, %v3076_v57  ;;  %v2232_v23 = vadd.f32 %v2231_v21, %v2230_v4  ;;  %2351 = vmatprep.mubr.bf16.mxu1 %v1415_v6 }
 0x331   :  { %v1352_v25 = vadd.f32 %v2232_v23, %v3076_v57  ;;  %v1397_v26 = vmax.f32 %v1349_v22, 0.0 }
 0x333   :  { %v1398_v27 = vmax.f32 %v1352_v25, 0.0  ;;  %v2233_v28 = vpop.f32.mrb[120].mxu0 }
 0x334   :  { %v2234_v29 = vpop.f32.mrb[121].mxu0 }
 0x335   :  { %v1416_v30 = vpack.c.bf16 %v1398_v27, %v1397_v26  ;;  %v2235_v31 = vadd.f32 %v2234_v29, %v2233_v28  ;;  %v2236_v32 = vpop.f32.mrb[122].mxu0 }
 0x336   :  { %v2237_v33 = vpop.f32.mrb[123].mxu0 }
 0x337   :  { %2352 = vmatmul.mubr.bf16.gmra.mrb[88].mxu1 %v1416_v30  ;;  %v1357_v34 = vadd.f32 %v2235_v31, %v3076_v57  ;;  %v2238_v35 = vadd.f32 %v2237_v33, %v2236_v32 }
 0x339   :  { %v1360_v36 = vadd.f32 %v2238_v35, %v3076_v57  ;;  %v1399_v37 = vmax.f32 %v1357_v34, 0.0 }
 0x33b   :  { %v1400_v38 = vmax.f32 %v1360_v36, 0.0  ;;  %v2239_v39 = vpop.f32.mrb[124].mxu0 }
 0x33c   :  { %v2240_v40 = vpop.f32.mrb[125].mxu0 }
 0x33d   :  { %v2241_v41 = vadd.f32 %v2240_v40, %v2239_v39  ;;  %v2242_v42 = vpop.f32.mrb[126].mxu0  ;;  %v1417_v43 = vpack.c.bf16 %v1400_v38, %v1399_v37 }
 0x33e   :  { %v2243_v44 = vpop.f32.mrb[127].mxu0 }
 0x33f   :  { %v1365_v45 = vadd.f32 %v2241_v41, %v3076_v57  ;;  %v2244_v46 = vadd.f32 %v2243_v44, %v2242_v42  ;;  %2355 = vmatprep.mubr.bf16.mxu1 %v1417_v43 }
 0x341   :  { %v1368_v47 = vadd.f32 %v2244_v46, %v3076_v57  ;;  %v1401_v48 = vmax.f32 %v1365_v45, 0.0 }
 0x343   :  { %v1402_v49 = vmax.f32 %v1368_v47, 0.0 }
 0x345   :  { %v1418_v50 = vpack.c.bf16 %v1402_v49, %v1401_v48 }
 0x347   :  { %2356 = vmatmul.mubr.bf16.gmra.mrb[92].mxu1 %v1418_v50 }
 0x3aa   :  { %v2329_v52 = vpop.f32.mrb[64].mxu1 }
 0x3ab   :  { %v1533_v53 = vadd.f32 %v2329_v52, %v3137_v51  ;;  %v1524_v54 = vpop.f32.mrb[65].mxu1 }
 0x3ac   :  { %v1525_v55 = vadd.f32 %v3137_v51, %v1524_v54  ;;  %v2330_v56 = vpop.f32.mrb[66].mxu1 }
 0x3ad   :  { %v1536_v58 = vadd.f32 %v2330_v56, %v3137_v51  ;;  %v1527_v13 = vpop.f32.mrb[67].mxu1  ;;  %v1653_v59 = vmax.f32 %v1533_v53, 0.0 }
 0x3ae   :  { %v1528_v57 = vadd.f32 %v3137_v51, %v1527_v13  ;;  %v1651_v7 = vmax.f32 %v1525_v55, 0.0 }
 0x3af   :  { %v1654_v60 = vmax.f32 %v1536_v58, 0.0 }
 0x3b0   :  { %v1652_v61 = vmax.f32 %v1528_v57, 0.0 }
 0x3b1   :  { %v1684_v62 = vpack.c.bf16 %v1654_v60, %v1653_v59 }
 0x3b2   :  { %v1683_v63 = vpack.c.bf16 %v1652_v61, %v1651_v7 }
 0x3b4   :  { %2375 = vmatprep.mubr.bf16.mxu1 %v1683_v63 }
 0x3b5   :  { %2376 = vmatmul.mubr.bf16.vlgmr.msra.gmra.mrb[96].mxu1 %v1684_v62 }
 0x3ba   :  { %v2333_v1 = vpop.f32.mrb[68].mxu1 }
 0x3bb   :  { %v1549_v2 = vadd.f32 %v2333_v1, %v3137_v51  ;;  %v1540_v5 = vpop.f32.mrb[69].mxu1 }
 0x3bc   :  { %v1541_v8 = vadd.f32 %v3137_v51, %v1540_v5  ;;  %v2334_v9 = vpop.f32.mrb[70].mxu1 }
 0x3bd   :  { %v1552_v10 = vadd.f32 %v2334_v9, %v3137_v51  ;;  %v1543_v11 = vpop.f32.mrb[71].mxu1  ;;  %v1657_v0 = vmax.f32 %v1549_v2, 0.0 }
 0x3be   :  { %v1544_v12 = vadd.f32 %v3137_v51, %v1543_v11  ;;  %v1655_v15 = vmax.f32 %v1541_v8, 0.0 }
 0x3bf   :  { %v1658_v14 = vmax.f32 %v1552_v10, 0.0 }
 0x3c0   :  { %v1656_v16 = vmax.f32 %v1544_v12, 0.0 }
 0x3c1   :  { %v1686_v17 = vpack.c.bf16 %v1658_v14, %v1657_v0 }
 0x3c2   :  { %v1685_v18 = vpack.c.bf16 %v1656_v16, %v1655_v15 }
 0x3c4   :  { %2379 = vmatprep.mubr.bf16.mxu1 %v1685_v18 }
 0x3c5   :  { %2380 = vmatmul.mubr.bf16.gmra.mrb[100].mxu1 %v1686_v17 }
 0x3ca   :  { %v2337_v19 = vpop.f32.mrb[72].mxu1 }
 0x3cb   :  { %v1565_v20 = vadd.f32 %v2337_v19, %v3137_v51  ;;  %v1556_v3 = vpop.f32.mrb[73].mxu1 }
 0x3cc   :  { %v1557_v4 = vadd.f32 %v3137_v51, %v1556_v3  ;;  %v2338_v6 = vpop.f32.mrb[74].mxu1 }
 0x3cd   :  { %v1568_v21 = vadd.f32 %v2338_v6, %v3137_v51  ;;  %v1559_v22 = vpop.f32.mrb[75].mxu1  ;;  %v1661_v24 = vmax.f32 %v1565_v20, 0.0 }
 0x3ce   :  { %v1560_v23 = vadd.f32 %v3137_v51, %v1559_v22  ;;  %v1659_v26 = vmax.f32 %v1557_v4, 0.0 }
 0x3cf   :  { %v1662_v25 = vmax.f32 %v1568_v21, 0.0 }
 0x3d0   :  { %v1660_v27 = vmax.f32 %v1560_v23, 0.0 }
 0x3d1   :  { %v1688_v28 = vpack.c.bf16 %v1662_v25, %v1661_v24 }
 0x3d2   :  { %v1687_v29 = vpack.c.bf16 %v1660_v27, %v1659_v26 }
 0x3d4   :  { %2383 = vmatprep.mubr.bf16.mxu1 %v1687_v29 }
 0x3d5   :  { %2384 = vmatmul.mubr.bf16.gmra.mrb[104].mxu1 %v1688_v28 }
 0x3da   :  { %v2341_v30 = vpop.f32.mrb[76].mxu1 }
 0x3db   :  { %v1581_v31 = vadd.f32 %v2341_v30, %v3137_v51  ;;  %v1572_v32 = vpop.f32.mrb[77].mxu1 }
 0x3dc   :  { %v1573_v33 = vadd.f32 %v3137_v51, %v1572_v32  ;;  %v2342_v34 = vpop.f32.mrb[78].mxu1 }
 0x3dd   :  { %v1584_v35 = vadd.f32 %v2342_v34, %v3137_v51  ;;  %v1575_v36 = vpop.f32.mrb[79].mxu1  ;;  %v1665_v38 = vmax.f32 %v1581_v31, 0.0 }
 0x3de   :  { %v1576_v37 = vadd.f32 %v3137_v51, %v1575_v36  ;;  %v1663_v40 = vmax.f32 %v1573_v33, 0.0 }
 0x3df   :  { %v1666_v39 = vmax.f32 %v1584_v35, 0.0 }
 0x3e0   :  { %v1664_v41 = vmax.f32 %v1576_v37, 0.0  ;;  %v3171_v37 = vld [vmem:[#allocation2] ss:$0 sm:$0xff] }
 0x3e1   :  { %v1690_v42 = vpack.c.bf16 %v1666_v39, %v1665_v38 }
 0x3e2   :  { %v1689_v43 = vpack.c.bf16 %v1664_v41, %v1663_v40 }
 0x3e4   :  { %2387 = vmatprep.mubr.bf16.mxu1 %v1689_v43 }
 0x3e5   :  { %2388 = vmatmul.mubr.bf16.gmra.mrb[108].mxu1 %v1690_v42 }
 0x3ea   :  { %v2345_v44 = vpop.f32.mrb[80].mxu1 }
 0x3eb   :  { %v1597_v45 = vadd.f32 %v2345_v44, %v3137_v51  ;;  %v1588_v46 = vpop.f32.mrb[81].mxu1  ;;  %v3179_v44 = vld [vmem:[%s3250_s11] sm:$0xf] }
 0x3ec   :  { %v1589_v47 = vadd.f32 %v3137_v51, %v1588_v46  ;;  %v2346_v48 = vpop.f32.mrb[82].mxu1  ;;  %2309 = vmatprep.mubr.bf16.mxu0 %v3179_v44 }
 0x3ed   :  { %v1600_v49 = vadd.f32 %v2346_v48, %v3137_v51  ;;  %v1591_v50 = vpop.f32.mrb[83].mxu1  ;;  %v1669_v53 = vmax.f32 %v1597_v45, 0.0 }
 0x3ee   :  { %v1592_v52 = vadd.f32 %v3137_v51, %v1591_v50  ;;  %v1667_v55 = vmax.f32 %v1589_v47, 0.0 }
 0x3ef   :  { %v1670_v54 = vmax.f32 %v1600_v49, 0.0 }
 0x3f0   :  { %v1668_v56 = vmax.f32 %v1592_v52, 0.0 }
 0x3f1   :  { %v1692_v58 = vpack.c.bf16 %v1670_v54, %v1669_v53  ;;  %v1980_v53 = vld [vmem:[%s3251_s12] sm:$0xff] }
 0x3f2   :  { %v1691_v13 = vpack.c.bf16 %v1668_v56, %v1667_v55  ;;  %1983 = vperm.xlu0 %2409, %v1980_v53  }
 0x3f4   :  { %2391 = vmatprep.mubr.bf16.mxu1 %v1691_v13 }
 0x3f5   :  { %2392 = vmatmul.mubr.bf16.gmra.mrb[112].mxu1 %v1692_v58 }
 0x3fa   :  { %v2349_v57 = vpop.f32.mrb[84].mxu1 }
 0x3fb   :  { %v1613_v59 = vadd.f32 %v2349_v57, %v3137_v51  ;;  %v1604_v60 = vpop.f32.mrb[85].mxu1 }
 0x3fc   :  { %v1605_v7 = vadd.f32 %v3137_v51, %v1604_v60  ;;  %v2350_v61 = vpop.f32.mrb[86].mxu1 }
 0x3fd   :  { %v1616_v62 = vadd.f32 %v2350_v61, %v3137_v51  ;;  %v1607_v63 = vpop.f32.mrb[87].mxu1  ;;  %v1673_v2 = vmax.f32 %v1613_v59, 0.0 }
 0x3fe   :  { %v1608_v1 = vadd.f32 %v3137_v51, %v1607_v63  ;;  %v1671_v8 = vmax.f32 %v1605_v7, 0.0 }
 0x3ff   :  { %v1674_v5 = vmax.f32 %v1616_v62, 0.0 }
 0x400   :  { %v1672_v9 = vmax.f32 %v1608_v1, 0.0 }
 0x401   :  { %v1694_v10 = vpack.c.bf16 %v1674_v5, %v1673_v2 }
 0x402   :  { %v1693_v11 = vpack.c.bf16 %v1672_v9, %v1671_v8 }
 0x404   :  { %2395 = vmatprep.mubr.bf16.mxu1 %v1693_v11 }
 0x405   :  { %2396 = vmatmul.mubr.bf16.gmra.mrb[116].mxu1 %v1694_v10 }
 0x40a   :  { %v2353_v12 = vpop.f32.mrb[88].mxu1 }
 0x40b   :  { %v1629_v0 = vadd.f32 %v2353_v12, %v3137_v51  ;;  %v1620_v14 = vpop.f32.mrb[89].mxu1 }
 0x40c   :  { %v1621_v15 = vadd.f32 %v3137_v51, %v1620_v14  ;;  %v2354_v16 = vpop.f32.mrb[90].mxu1 }
 0x40d   :  { %v1632_v17 = vadd.f32 %v2354_v16, %v3137_v51  ;;  %v1623_v18 = vpop.f32.mrb[91].mxu1  ;;  %v1677_v20 = vmax.f32 %v1629_v0, 0.0 }
 0x40e   :  { %v1624_v19 = vadd.f32 %v3137_v51, %v1623_v18  ;;  %v1675_v4 = vmax.f32 %v1621_v15, 0.0 }
 0x40f   :  { %v1678_v3 = vmax.f32 %v1632_v17, 0.0 }
 0x410   :  { %v1676_v6 = vmax.f32 %v1624_v19, 0.0 }
 0x411   :  { %v1696_v21 = vpack.c.bf16 %v1678_v3, %v1677_v20 }
 0x412   :  { %v1695_v22 = vpack.c.bf16 %v1676_v6, %v1675_v4 }
 0x414   :  { %2399 = vmatprep.mubr.bf16.mxu1 %v1695_v22 }
 0x415   :  { %2400 = vmatmul.mubr.bf16.gmra.mrb[120].mxu1 %v1696_v21 }
 0x41a   :  { %v2357_v23 = vpop.f32.mrb[92].mxu1 }
 0x41b   :  { %v1645_v24 = vadd.f32 %v2357_v23, %v3137_v51  ;;  %v1636_v25 = vpop.f32.mrb[93].mxu1 }
 0x41c   :  { %v1637_v26 = vadd.f32 %v3137_v51, %v1636_v25  ;;  %v2358_v27 = vpop.f32.mrb[94].mxu1 }
 0x41d   :  { %v1648_v28 = vadd.f32 %v2358_v27, %v3137_v51  ;;  %v1639_v29 = vpop.f32.mrb[95].mxu1  ;;  %v1681_v31 = vmax.f32 %v1645_v24, 0.0 }
 0x41e   :  { %v1640_v30 = vadd.f32 %v3137_v51, %v1639_v29  ;;  %v1679_v33 = vmax.f32 %v1637_v26, 0.0 }
 0x41f   :  { %v1682_v32 = vmax.f32 %v1648_v28, 0.0 }
 0x420   :  { %v1680_v34 = vmax.f32 %v1640_v30, 0.0 }
 0x421   :  { %v1698_v35 = vpack.c.bf16 %v1682_v32, %v1681_v31 }
 0x422   :  { %v1697_v36 = vpack.c.bf16 %v1680_v34, %v1679_v33 }
 0x424   :  { %2403 = vmatprep.mubr.bf16.mxu1 %v1697_v36 }
 0x425   :  { %2404 = vmatmul.mubr.bf16.gmra.mrb[124].mxu1 %v1698_v35 }
 0x488   :  { %v2377_v38 = vpop.f32.mrb[96].mxu1 }
 0x489   :  { %v1813_v39 = vadd.f32 %v2377_v38, %v3171_v37  ;;  %v1804_v40 = vpop.f32.mrb[97].mxu1 }
 0x48a   :  { %v1805_v41 = vadd.f32 %v3171_v37, %v1804_v40  ;;  %v2378_v42 = vpop.f32.mrb[98].mxu1 }
 0x48b   :  { %v1816_v43 = vadd.f32 %v2378_v42, %v3171_v37  ;;  %v1807_v51 = vpop.f32.mrb[99].mxu1  ;;  %v1933_v46 = vmax.f32 %v1813_v39, 0.0 }
 0x48c   :  { %v1808_v45 = vadd.f32 %v3171_v37, %v1807_v51  ;;  %v1931_v48 = vmax.f32 %v1805_v41, 0.0 }
 0x48d   :  { %v1934_v47 = vmax.f32 %v1816_v43, 0.0 }
 0x48e   :  { %v1932_v49 = vmax.f32 %v1808_v45, 0.0 }
 0x48f   :  { %v3183_v50 = vpack.c.bf16 %v1934_v47, %v1933_v46 }
 0x490   :  { %v1963_v52 = vpack.c.bf16 %v1932_v49, %v1931_v48 }
 0x498   :  { %v2381_v54 = vpop.f32.mrb[100].mxu1 }
 0x499   :  { %v1829_v55 = vadd.f32 %v2381_v54, %v3171_v37  ;;  %v1820_v56 = vpop.f32.mrb[101].mxu1 }
 0x49a   :  { %v1821_v58 = vadd.f32 %v3171_v37, %v1820_v56  ;;  %v2382_v13 = vpop.f32.mrb[102].mxu1 }
 0x49b   :  { %v1832_v57 = vadd.f32 %v2382_v13, %v3171_v37  ;;  %v1823_v59 = vpop.f32.mrb[103].mxu1  ;;  %v1937_v7 = vmax.f32 %v1829_v55, 0.0 }
 0x49c   :  { %v1824_v60 = vadd.f32 %v3171_v37, %v1823_v59  ;;  %v1935_v62 = vmax.f32 %v1821_v58, 0.0 }
 0x49d   :  { %v1938_v61 = vmax.f32 %v1832_v57, 0.0 }
 0x49e   :  { %v1936_v63 = vmax.f32 %v1824_v60, 0.0 }
 0x49f   :  { %v3192_v1 = vpack.c.bf16 %v1938_v61, %v1937_v7 }
 0x4a0   :  { %v1965_v2 = vpack.c.bf16 %v1936_v63, %v1935_v62 }
 0x4a8   :  { %v2385_v5 = vpop.f32.mrb[104].mxu1 }
 0x4a9   :  { %v1845_v8 = vadd.f32 %v2385_v5, %v3171_v37  ;;  %v1836_v9 = vpop.f32.mrb[105].mxu1 }
 0x4aa   :  { %v1837_v10 = vadd.f32 %v3171_v37, %v1836_v9  ;;  %v2386_v11 = vpop.f32.mrb[106].mxu1 }
 0x4ab   :  { %v1848_v12 = vadd.f32 %v2386_v11, %v3171_v37  ;;  %v1839_v0 = vpop.f32.mrb[107].mxu1  ;;  %v1941_v15 = vmax.f32 %v1845_v8, 0.0 }
 0x4ac   :  { %v1840_v14 = vadd.f32 %v3171_v37, %v1839_v0  ;;  %v1939_v17 = vmax.f32 %v1837_v10, 0.0 }
 0x4ad   :  { %v1942_v16 = vmax.f32 %v1848_v12, 0.0 }
 0x4ae   :  { %v1940_v18 = vmax.f32 %v1840_v14, 0.0 }
 0x4af   :  { %v3198_v19 = vpack.c.bf16 %v1942_v16, %v1941_v15 }
 0x4b0   :  { %v3200_v20 = vpack.c.bf16 %v1940_v18, %v1939_v17 }
 0x4b8   :  { %v2389_v3 = vpop.f32.mrb[108].mxu1 }
 0x4b9   :  { %v1861_v4 = vadd.f32 %v2389_v3, %v3171_v37  ;;  %v1852_v6 = vpop.f32.mrb[109].mxu1 }
 0x4ba   :  { %v1853_v21 = vadd.f32 %v3171_v37, %v1852_v6  ;;  %v2390_v22 = vpop.f32.mrb[110].mxu1 }
 0x4bb   :  { %v1864_v23 = vadd.f32 %v2390_v22, %v3171_v37  ;;  %v1855_v24 = vpop.f32.mrb[111].mxu1  ;;  %v1945_v26 = vmax.f32 %v1861_v4, 0.0 }
 0x4bc   :  { %v1856_v25 = vadd.f32 %v3171_v37, %v1855_v24  ;;  %v1943_v28 = vmax.f32 %v1853_v21, 0.0 }
 0x4bd   :  { %v1946_v27 = vmax.f32 %v1864_v23, 0.0 }
 0x4be   :  { %v1944_v29 = vmax.f32 %v1856_v25, 0.0 }
 0x4bf   :  { %v3206_v30 = vpack.c.bf16 %v1946_v27, %v1945_v26  ;;  %v1984_v27 = vpop.permute.xlu0 %1983 }
 0x4c0   :  { %v3208_v31 = vpack.c.bf16 %v1944_v29, %v1943_v28 }
 0x4c8   :  { %v2393_v32 = vpop.f32.mrb[112].mxu1 }
 0x4c9   :  { %v1877_v33 = vadd.f32 %v2393_v32, %v3171_v37  ;;  %v1868_v34 = vpop.f32.mrb[113].mxu1 }
 0x4ca   :  { %v1869_v35 = vadd.f32 %v3171_v37, %v1868_v34  ;;  %v2394_v36 = vpop.f32.mrb[114].mxu1 }
 0x4cb   :  { %v1880_v38 = vadd.f32 %v2394_v36, %v3171_v37  ;;  %v1871_v39 = vpop.f32.mrb[115].mxu1  ;;  %v1949_v41 = vmax.f32 %v1877_v33, 0.0 }
 0x4cc   :  { %v1872_v40 = vadd.f32 %v3171_v37, %v1871_v39  ;;  %v1947_v43 = vmax.f32 %v1869_v35, 0.0 }
 0x4cd   :  { %v1950_v42 = vmax.f32 %v1880_v38, 0.0 }
 0x4ce   :  { %v1948_v51 = vmax.f32 %v1872_v40, 0.0 }
 0x4cf   :  { %v1972_v45 = vpack.c.bf16 %v1950_v42, %v1949_v41 }
 0x4d0   :  { %v1971_v46 = vpack.c.bf16 %v1948_v51, %v1947_v43 }
 0x4d2   :  { %2293 = vmatprep.subr.bf16.mxu0 %v1971_v46 }
 0x4d3   :  { %2294 = vmatpush3.bf16.xpose.msra.mxu0 %v1963_v52 }
 0x4d4   :  { %2295 = vmatprep.subr.bf16.mxu0 %v1972_v45 }
 0x4d8   :  { %v2397_v47 = vpop.f32.mrb[116].mxu1 }
 0x4d9   :  { %v1893_v48 = vadd.f32 %v2397_v47, %v3171_v37  ;;  %v1884_v49 = vpop.f32.mrb[117].mxu1 }
 0x4da   :  { %v1885_v53 = vadd.f32 %v3171_v37, %v1884_v49  ;;  %v2398_v54 = vpop.f32.mrb[118].mxu1 }
 0x4db   :  { %v1896_v55 = vadd.f32 %v2398_v54, %v3171_v37  ;;  %v1887_v56 = vpop.f32.mrb[119].mxu1  ;;  %2296 = vmatpush3.bf16.xpose.msra.mxu0 %v3183_v50  ;;  %v1953_v13 = vmax.f32 %v1893_v48, 0.0 }
 0x4dc   :  { %v1888_v58 = vadd.f32 %v3171_v37, %v1887_v56  ;;  %v1951_v59 = vmax.f32 %v1885_v53, 0.0 }
 0x4dd   :  { %v1954_v57 = vmax.f32 %v1896_v55, 0.0 }
 0x4de   :  { %v1952_v60 = vmax.f32 %v1888_v58, 0.0 }
 0x4df   :  { %v1974_v52 = vpack.c.bf16 %v1954_v57, %v1953_v13 }
 0x4e0   :  { %v1973_v7 = vpack.c.bf16 %v1952_v60, %v1951_v59 }
 0x4e2   :  { %2297 = vmatprep.subr.bf16.mxu0 %v1973_v7 }
 0x4e3   :  { %2298 = vmatpush3.bf16.xpose.msra.mxu0 %v1965_v2 }
 0x4e4   :  { %2299 = vmatprep.subr.bf16.mxu0 %v1974_v52 }
 0x4e8   :  { %v2401_v61 = vpop.f32.mrb[120].mxu1 }
 0x4e9   :  { %v1909_v62 = vadd.f32 %v2401_v61, %v3171_v37  ;;  %v1900_v63 = vpop.f32.mrb[121].mxu1 }
 0x4ea   :  { %v1901_v5 = vadd.f32 %v3171_v37, %v1900_v63  ;;  %v2402_v8 = vpop.f32.mrb[122].mxu1 }
 0x4eb   :  { %v1912_v50 = vadd.f32 %v2402_v8, %v3171_v37  ;;  %v1903_v9 = vpop.f32.mrb[123].mxu1  ;;  %2300 = vmatpush3.bf16.xpose.msra.mxu0 %v3192_v1  ;;  %v1957_v11 = vmax.f32 %v1909_v62, 0.0 }
 0x4ec   :  { %v1904_v10 = vadd.f32 %v3171_v37, %v1903_v9  ;;  %v1955_v0 = vmax.f32 %v1901_v5, 0.0 }
 0x4ed   :  { %v1958_v12 = vmax.f32 %v1912_v50, 0.0 }
 0x4ee   :  { %v1956_v14 = vmax.f32 %v1904_v10, 0.0 }
 0x4ef   :  { %v1976_v2 = vpack.c.bf16 %v1958_v12, %v1957_v11 }
 0x4f0   :  { %v1975_v15 = vpack.c.bf16 %v1956_v14, %v1955_v0 }
 0x4f2   :  { %2301 = vmatprep.subr.bf16.mxu0 %v1975_v15 }
 0x4f3   :  { %2302 = vmatpush3.bf16.xpose.msra.mxu0 %v3200_v20 }
 0x4f4   :  { %2303 = vmatprep.subr.bf16.mxu0 %v1976_v2 }
 0x4f8   :  { %v2405_v16 = vpop.f32.mrb[124].mxu1 }
 0x4f9   :  { %v1925_v17 = vadd.f32 %v2405_v16, %v3171_v37  ;;  %v1916_v18 = vpop.f32.mrb[125].mxu1 }
 0x4fa   :  { %v1917_v3 = vadd.f32 %v3171_v37, %v1916_v18  ;;  %v2406_v4 = vpop.f32.mrb[126].mxu1 }
 0x4fb   :  { %v1928_v1 = vadd.f32 %v2406_v4, %v3171_v37  ;;  %v1919_v6 = vpop.f32.mrb[127].mxu1  ;;  %2304 = vmatpush3.bf16.xpose.msra.mxu0 %v3198_v19  ;;  %v1961_v22 = vmax.f32 %v1925_v17, 0.0 }
 0x4fc   :  { %v1920_v21 = vadd.f32 %v3171_v37, %v1919_v6  ;;  %v1959_v24 = vmax.f32 %v1917_v3, 0.0 }
 0x4fd   :  { %v1962_v23 = vmax.f32 %v1928_v1, 0.0 }
 0x4fe   :  { %v1960_v25 = vmax.f32 %v1920_v21, 0.0 }
 0x4ff   :  { %v1978_v20 = vpack.c.bf16 %v1962_v23, %v1961_v22 }
 0x500   :  { %v1977_v26 = vpack.c.bf16 %v1960_v25, %v1959_v24 }
 0x502   :  { %2305 = vmatprep.subr.bf16.mxu0 %v1977_v26 }
 0x503   :  { %2306 = vmatpush3.bf16.xpose.msra.mxu0 %v3208_v31 }
 0x504   :  { %2307 = vmatprep.subr.bf16.mxu0 %v1978_v20 }
 0x50b   :  { %2308 = vmatpush3.bf16.xpose.msra.mxu0 %v3206_v30 }
 0x512   :  { %2310 = vmatmul.mubr.bf16.vlgmr.msra.gmra.mrb[128].mxu0 %v3179_v44 }
 0x5e5   :  { %v2020_v28 = vpop.f32.mrb[128].mxu0 }
 0x5e6   :  { %v2022_v29 = vpop.f32.mrb[129].mxu0  ;;  %v2021_v19 = vadd.f32 %v2020_v28, %v1984_v27 }
 0x5e7   :  { %v2024_v32 = vpop.f32.mrb[130].mxu0  ;;  %v2023_v37 = vadd.f32 %v2022_v29, %v1984_v27 }
 0x5e8   :  { %2027 = vst [vmem:[%s3252_s13] sm:$0xff] %v2021_v19  ;;  %v2025_v33 = vpop.f32.mrb[131].mxu0 }
 0x5e9   :  { %2028 = vst [vmem:[%s3252_s13 + $0x8] sm:$0xff] %v2023_v37 }
 0x5ea   :  { %2033 = vsyncpa [#allocation3], 1 }

</bundles_post_ra>
